<compile_context>
chip_gen: v7x
topology: tpu7x:2x2x1
jax: 0.10.0
libtpu: 0.0.40
codegen_flags: <defaults>
</compile_context>

<pallas_src>
import numpy as np
import jax
import jax.numpy as jnp
from jax.experimental import pallas as pl
from jax.experimental.pallas import tpu as pltpu

BN_EPS = 1e-5


def basic_block_kernel(x_ref, w1_ref, g1_ref, b1_ref, rm_ref, rmt_ref,
                       w2_ref, g2_ref, b2_ref, ro_ref, rot_ref,
                       out_ref, pad1_ref, pad2_ref):
    # x_ref:   (N, H, W*Cin)       lane-dense input (W folded into lanes)
    # w*_ref:  (3, W*Cin, W*Cout)  banded per-ky weight matrices (W padding folded in)
    # g*/b*:   (1, C)
    # r*_ref:  (W*C, C) / (C, W*C) constant channel-selection matrices for BN stats
    # out_ref: (N, H, W*Cout)      lane-dense output
    # pad*_ref: VMEM scratch (N, H+2, W*C) -- H-halo-padded activations
    N, H, WCin = x_ref.shape
    Cmid = g1_ref.shape[1]
    WCmid = w1_ref.shape[2]
    WCout = w2_ref.shape[2]
    rows = N * H
    W = WCmid // Cmid
    count = rows * W                      # BN sample count per channel (N*H*W)

    x = x_ref[...].astype(jnp.float32)    # (N, H, W*Cin)

    def conv3x3(pad_ref, w_ref, n_out):
        # 3 banded matmuls (one per ky tap): (N*H, W*Ci) @ (W*Ci, W*Co)
        acc = jnp.zeros((rows, n_out), jnp.float32)
        for dy in range(3):
            a = pad_ref[:, dy:dy + H, :].reshape(rows, -1)   # minor dim unchanged
            acc = acc + jnp.dot(a, w_ref[dy], preferred_element_type=jnp.float32)
        return acc

    def batchnorm(vals, g_ref, b_ref, r_ref, rt_ref):
        # vals: (N*H, W*C) lane-dense. Per-channel training-mode batch stats,
        # extracted / re-broadcast with constant selection matmuls (no relayouts).
        g = g_ref[...].astype(jnp.float32)          # (1, C)
        b = b_ref[...].astype(jnp.float32)          # (1, C)
        r = r_ref[...]                              # (W*C, C)
        rt = rt_ref[...]                            # (C, W*C)
        inv_n = 1.0 / count
        mean_c = jnp.dot(jnp.sum(vals, axis=0, keepdims=True), r,
                         preferred_element_type=jnp.float32) * inv_n        # (1, C)
        centered = vals - jnp.dot(mean_c, rt, preferred_element_type=jnp.float32)
        var_c = jnp.dot(jnp.sum(centered * centered, axis=0, keepdims=True), r,
                        preferred_element_type=jnp.float32) * inv_n         # (1, C)
        scale_c = g * jax.lax.rsqrt(var_c + BN_EPS)                         # (1, C)
        scale_d = jnp.dot(scale_c, rt, preferred_element_type=jnp.float32)  # (1, W*C)
        shift_d = jnp.dot(b, rt, preferred_element_type=jnp.float32)        # (1, W*C)
        return centered * scale_d + shift_d          # lane-dense normalize

    # ---- conv1: zero only the two H-halo rows, write interior once ----
    pad1_ref[:, 0:1, :] = jnp.zeros((N, 1, WCin), jnp.float32)
    pad1_ref[:, H + 1:H + 2, :] = jnp.zeros((N, 1, WCin), jnp.float32)
    pad1_ref[:, 1:H + 1, :] = x

    acc1 = conv3x3(pad1_ref, w1_ref, WCmid)
    out1 = batchnorm(acc1, g1_ref, b1_ref, rm_ref, rmt_ref)

    # ---- conv2: re-pad intermediate (halo rows only) ----
    pad2_ref[:, 0:1, :] = jnp.zeros((N, 1, WCmid), jnp.float32)
    pad2_ref[:, H + 1:H + 2, :] = jnp.zeros((N, 1, WCmid), jnp.float32)
    pad2_ref[:, 1:H + 1, :] = out1.reshape(N, H, WCmid)

    acc2 = conv3x3(pad2_ref, w2_ref, WCout)

    # ---- residual add (downsample is None -> identity = x; Cout == Cin) ----
    res = acc2 + x.reshape(rows, WCin)

    # ---- bn2, lane-dense store ----
    out2 = batchnorm(res, g2_ref, b2_ref, ro_ref, rot_ref)
    out_ref[...] = out2.reshape(N, H, WCout).astype(out_ref.dtype)


def _banded_weights(w_oihw, W):
    """OIHW (Co, Ci, 3, 3) -> (3, W*Ci, W*Co) per-ky banded matrices.

    band[dy, u*Ci + ci, w*Co + co] = weight[co, ci, dy, dx]  where u = w + dx - 1,
    clipped to [0, W) which implements the W-direction zero padding implicitly.
    """
    Co, Ci, KH, KW = w_oihw.shape
    w_hwio = jnp.transpose(w_oihw, (2, 3, 1, 0)).astype(jnp.float32)   # (3, 3, Ci, Co)
    sel = np.zeros((KW, W, W), np.float32)
    for dx in range(KW):
        for w in range(W):
            u = w + dx - 1
            if 0 <= u < W:
                sel[dx, u, w] = 1.0
    band = jnp.einsum('xuw,yxio->yuiwo', jnp.asarray(sel), w_hwio)     # (3, W, Ci, W, Co)
    return band.reshape(KH, W * Ci, W * Co)


def basic_block_pallas(x_nchw, w1, g1, b1, w2, g2, b2):
    """x_nchw: (N, Cin, H, W); w1: (Cmid, Cin, 3, 3); w2: (Cout, Cmid, 3, 3)."""
    N, Cin, H, W = x_nchw.shape
    Cmid, Cout = w1.shape[0], w2.shape[0]
    assert w1.shape[1] == Cin and w2.shape[1] == Cmid
    assert Cout == Cin, "downsample is None, so planes must equal inplanes"

    # NHWC, then fold W into the lane axis -> (N, H, W*C): free reshape in HBM.
    x_dense = jnp.transpose(x_nchw, (0, 2, 3, 1)).reshape(N, H, W * Cin)

    w1_band = _banded_weights(w1, W)     # (3, W*Cin, W*Cmid)
    w2_band = _banded_weights(w2, W)     # (3, W*Cmid, W*Cout)

    # Constant channel-selection matrices for BN stats in the lane-packed layout.
    rm_np = np.tile(np.eye(Cmid, dtype=np.float32), (W, 1))   # (W*Cmid, Cmid)
    ro_np = np.tile(np.eye(Cout, dtype=np.float32), (W, 1))   # (W*Cout, Cout)
    rm, rmt = jnp.asarray(rm_np), jnp.asarray(rm_np.T)
    ro, rot = jnp.asarray(ro_np), jnp.asarray(ro_np.T)

    g1r, b1r = g1.reshape(1, Cmid).astype(jnp.float32), b1.reshape(1, Cmid).astype(jnp.float32)
    g2r, b2r = g2.reshape(1, Cout).astype(jnp.float32), b2.reshape(1, Cout).astype(jnp.float32)

    def full(shape):
        return pl.BlockSpec(shape, lambda i: (0,) * len(shape))

    out_dense = pl.pallas_call(
        basic_block_kernel,
        out_shape=jax.ShapeDtypeStruct((N, H, W * Cout), x_nchw.dtype),
        grid=(1,),
        in_specs=[full(x_dense.shape),
                  full(w1_band.shape), full(g1r.shape), full(b1r.shape),
                  full(rm.shape), full(rmt.shape),
                  full(w2_band.shape), full(g2r.shape), full(b2r.shape),
                  full(ro.shape), full(rot.shape)],
        out_specs=full((N, H, W * Cout)),
        scratch_shapes=[pltpu.VMEM((N, H + 2, W * Cin), jnp.float32),
                        pltpu.VMEM((N, H + 2, W * Cmid), jnp.float32)],
        compiler_params=pltpu.CompilerParams(dimension_semantics=("arbitrary",)),
    )(x_dense, w1_band, g1r, b1r, rm, rmt, w2_band, g2r, b2r, ro, rot)

    return jnp.transpose(out_dense.reshape(N, H, W, Cout), (0, 3, 1, 2))


def basic_block_ref(x, w1, g1, b1, w2, g2, b2):
    """Pure-JAX reference (NCHW), mirroring PyTorch BasicBlock in training mode."""
    def conv3x3(x, w):
        return jax.lax.conv_general_dilated(
            x, w, window_strides=(1, 1), padding=((1, 1), (1, 1)),
            dimension_numbers=("NCHW", "OIHW", "NCHW"))

    def bn(x, g, b):
        m = jnp.mean(x, axis=(0, 2, 3), keepdims=True)
        v = jnp.mean((x - m) ** 2, axis=(0, 2, 3), keepdims=True)
        return (x - m) * jax.lax.rsqrt(v + BN_EPS) * g.reshape(1, -1, 1, 1) + b.reshape(1, -1, 1, 1)

    out = bn(conv3x3(x, w1), g1, b1)
    out = conv3x3(out, w2)
    out = out + x
    return bn(out, g2, b2)


if __name__ == "__main__":
    key = jax.random.PRNGKey(0)
    ks = jax.random.split(key, 7)
    N, Cin, H, W = 2, 8, 16, 16            # W * C = 128 -> exactly one lane group
    Cmid, Cout = 8, 8                       # inplanes = midplanes = planes = 8

    x = jax.random.normal(ks[0], (N, Cin, H, W), jnp.float32)
    w1 = jax.random.normal(ks[1], (Cmid, Cin, 3, 3), jnp.float32) * 0.1
    g1 = 1.0 + 0.1 * jax.random.normal(ks[2], (Cmid,), jnp.float32)
    b1 = 0.1 * jax.random.normal(ks[3], (Cmid,), jnp.float32)
    w2 = jax.random.normal(ks[4], (Cout, Cmid, 3, 3), jnp.float32) * 0.1
    g2 = 1.0 + 0.1 * jax.random.normal(ks[5], (Cout,), jnp.float32)
    b2 = 0.1 * jax.random.normal(ks[6], (Cout,), jnp.float32)

    out = basic_block_pallas(x, w1, g1, b1, w2, g2, b2)
    out = jax.block_until_ready(out)

    ref = basic_block_ref(x, w1, g1, b1, w2, g2, b2)
    assert out.shape == ref.shape
    max_err = float(jnp.max(jnp.abs(out - ref)))
    assert jnp.allclose(out, ref, atol=1e-3, rtol=1e-3), f"max abs err = {max_err}"

    print("KERNEL_OK")
</pallas_src>

<mosaic_0001>
module attributes {stable_mosaic.version = 11 : i64} {
  func.func @basic_block_kernel(%arg0: i32, %arg1: memref<2x16x128xf32, #tpu.memory_space<vmem>>, %arg2: memref<3x128x128xf32, #tpu.memory_space<vmem>>, %arg3: memref<1x8xf32, #tpu.memory_space<vmem>>, %arg4: memref<1x8xf32, #tpu.memory_space<vmem>>, %arg5: memref<128x8xf32, #tpu.memory_space<vmem>>, %arg6: memref<8x128xf32, #tpu.memory_space<vmem>>, %arg7: memref<3x128x128xf32, #tpu.memory_space<vmem>>, %arg8: memref<1x8xf32, #tpu.memory_space<vmem>>, %arg9: memref<1x8xf32, #tpu.memory_space<vmem>>, %arg10: memref<128x8xf32, #tpu.memory_space<vmem>>, %arg11: memref<8x128xf32, #tpu.memory_space<vmem>>, %arg12: memref<2x16x128xf32, #tpu.memory_space<vmem>>, %arg13: memref<2x18x128xf32, #tpu.memory_space<vmem>>, %arg14: memref<2x18x128xf32, #tpu.memory_space<vmem>>) attributes {dimension_semantics = [#tpu.dimension_semantics<arbitrary>], iteration_bounds = array<i64: 1>, scalar_prefetch = 0 : i64, scratch_operands = 2 : i64, tpu.core_type = #tpu.core_type<tc>, window_params = [{pipeline_mode = #tpu.pipeline_mode<synchronous>, transform_indices = @transform_0, window_bounds = array<i64: 2, 16, 128>}, {pipeline_mode = #tpu.pipeline_mode<synchronous>, transform_indices = @transform_1, window_bounds = array<i64: 3, 128, 128>}, {pipeline_mode = #tpu.pipeline_mode<synchronous>, transform_indices = @transform_2, window_bounds = array<i64: 1, 8>}, {pipeline_mode = #tpu.pipeline_mode<synchronous>, transform_indices = @transform_3, window_bounds = array<i64: 1, 8>}, {pipeline_mode = #tpu.pipeline_mode<synchronous>, transform_indices = @transform_4, window_bounds = array<i64: 128, 8>}, {pipeline_mode = #tpu.pipeline_mode<synchronous>, transform_indices = @transform_5, window_bounds = array<i64: 8, 128>}, {pipeline_mode = #tpu.pipeline_mode<synchronous>, transform_indices = @transform_6, window_bounds = array<i64: 3, 128, 128>}, {pipeline_mode = #tpu.pipeline_mode<synchronous>, transform_indices = @transform_7, window_bounds = array<i64: 1, 8>}, {pipeline_mode = #tpu.pipeline_mode<synchronous>, transform_indices = @transform_8, window_bounds = array<i64: 1, 8>}, {pipeline_mode = #tpu.pipeline_mode<synchronous>, transform_indices = @transform_9, window_bounds = array<i64: 128, 8>}, {pipeline_mode = #tpu.pipeline_mode<synchronous>, transform_indices = @transform_10, window_bounds = array<i64: 8, 128>}, {pipeline_mode = #tpu.pipeline_mode<synchronous>, transform_indices = @transform_11, window_bounds = array<i64: 2, 16, 128>}]} {
    %c0 = arith.constant 0 : index
    %c0_0 = arith.constant 0 : index
    %c0_1 = arith.constant 0 : index
    %0 = vector.load %arg1[%c0, %c0_0, %c0_1] : memref<2x16x128xf32, #tpu.memory_space<vmem>>, vector<2x16x128xf32>
    %cst = arith.constant 0.000000e+00 : f32
    %1 = vector.broadcast %cst : f32 to vector<2x1x128xf32>
    %c0_2 = arith.constant 0 : index
    %c0_3 = arith.constant 0 : index
    %c0_4 = arith.constant 0 : index
    %2 = vector.load %arg13[%c0_2, %c0_3, %c0_4] : memref<2x18x128xf32, #tpu.memory_space<vmem>>, vector<2x1x128xf32>
    tpu.vector_store %arg13[%c0_2, %c0_3, %c0_4], %1 {strides = array<i32>} : memref<2x18x128xf32, #tpu.memory_space<vmem>>, vector<2x1x128xf32>,
    %cst_5 = arith.constant 0.000000e+00 : f32
    %3 = vector.broadcast %cst_5 : f32 to vector<2x1x128xf32>
    %c0_6 = arith.constant 0 : index
    %c17 = arith.constant 17 : index
    %c0_7 = arith.constant 0 : index
    %4 = vector.load %arg13[%c0_6, %c17, %c0_7] : memref<2x18x128xf32, #tpu.memory_space<vmem>>, vector<2x1x128xf32>
    tpu.vector_store %arg13[%c0_6, %c17, %c0_7], %3 {strides = array<i32>} : memref<2x18x128xf32, #tpu.memory_space<vmem>>, vector<2x1x128xf32>,
    %c0_8 = arith.constant 0 : index
    %c1 = arith.constant 1 : index
    %c0_9 = arith.constant 0 : index
    %5 = vector.load %arg13[%c0_8, %c1, %c0_9] : memref<2x18x128xf32, #tpu.memory_space<vmem>>, vector<2x16x128xf32>
    tpu.vector_store %arg13[%c0_8, %c1, %c0_9], %0 {strides = array<i32>} : memref<2x18x128xf32, #tpu.memory_space<vmem>>, vector<2x16x128xf32>,
    %cst_10 = arith.constant 0.000000e+00 : f32
    %6 = vector.broadcast %cst_10 : f32 to vector<32x128xf32>
    %c0_11 = arith.constant 0 : index
    %c0_12 = arith.constant 0 : index
    %c0_13 = arith.constant 0 : index
    %7 = vector.load %arg13[%c0_11, %c0_12, %c0_13] : memref<2x18x128xf32, #tpu.memory_space<vmem>>, vector<2x16x128xf32>
    %8 = vector.shape_cast %7 : vector<2x16x128xf32> to vector<32x128xf32>
    %c0_14 = arith.constant 0 : index
    %c0_15 = arith.constant 0 : index
    %c0_16 = arith.constant 0 : index
    %9 = vector.load %arg2[%c0_14, %c0_15, %c0_16] : memref<3x128x128xf32, #tpu.memory_space<vmem>>, vector<1x128x128xf32>
    %10 = vector.shape_cast %9 : vector<1x128x128xf32> to vector<128x128xf32>
    %cst_17 = arith.constant dense<0.000000e+00> : vector<32x128xf32>
    %11 = tpu.matmul %8, %10, %cst_17 {dimension_numbers = #tpu.dot_dimension_numbers<[1], [0], [0], [1], [0, 0, 1, 1], [], []>} : vector<32x128xf32>, vector<128x128xf32>, vector<32x128xf32> -> vector<32x128xf32>
    %12 = arith.addf %6, %11 : vector<32x128xf32>
    %c0_18 = arith.constant 0 : index
    %c1_19 = arith.constant 1 : index
    %c0_20 = arith.constant 0 : index
    %13 = vector.load %arg13[%c0_18, %c1_19, %c0_20] : memref<2x18x128xf32, #tpu.memory_space<vmem>>, vector<2x16x128xf32>
    %14 = vector.shape_cast %13 : vector<2x16x128xf32> to vector<32x128xf32>
    %c1_21 = arith.constant 1 : index
    %c0_22 = arith.constant 0 : index
    %c0_23 = arith.constant 0 : index
    %15 = vector.load %arg2[%c1_21, %c0_22, %c0_23] : memref<3x128x128xf32, #tpu.memory_space<vmem>>, vector<1x128x128xf32>
    %16 = vector.shape_cast %15 : vector<1x128x128xf32> to vector<128x128xf32>
    %cst_24 = arith.constant dense<0.000000e+00> : vector<32x128xf32>
    %17 = tpu.matmul %14, %16, %cst_24 {dimension_numbers = #tpu.dot_dimension_numbers<[1], [0], [0], [1], [0, 0, 1, 1], [], []>} : vector<32x128xf32>, vector<128x128xf32>, vector<32x128xf32> -> vector<32x128xf32>
    %18 = arith.addf %12, %17 : vector<32x128xf32>
    %c0_25 = arith.constant 0 : index
    %c2 = arith.constant 2 : index
    %c0_26 = arith.constant 0 : index
    %19 = vector.load %arg13[%c0_25, %c2, %c0_26] : memref<2x18x128xf32, #tpu.memory_space<vmem>>, vector<2x16x128xf32>
    %20 = vector.shape_cast %19 : vector<2x16x128xf32> to vector<32x128xf32>
    %c2_27 = arith.constant 2 : index
    %c0_28 = arith.constant 0 : index
    %c0_29 = arith.constant 0 : index
    %21 = vector.load %arg2[%c2_27, %c0_28, %c0_29] : memref<3x128x128xf32, #tpu.memory_space<vmem>>, vector<1x128x128xf32>
    %22 = vector.shape_cast %21 : vector<1x128x128xf32> to vector<128x128xf32>
    %cst_30 = arith.constant dense<0.000000e+00> : vector<32x128xf32>
    %23 = tpu.matmul %20, %22, %cst_30 {dimension_numbers = #tpu.dot_dimension_numbers<[1], [0], [0], [1], [0, 0, 1, 1], [], []>} : vector<32x128xf32>, vector<128x128xf32>, vector<32x128xf32> -> vector<32x128xf32>
    %24 = arith.addf %18, %23 : vector<32x128xf32>
    %c0_31 = arith.constant 0 : index
    %c0_32 = arith.constant 0 : index
    %25 = vector.load %arg3[%c0_31, %c0_32] : memref<1x8xf32, #tpu.memory_space<vmem>>, vector<1x8xf32>
    %c0_33 = arith.constant 0 : index
    %c0_34 = arith.constant 0 : index
    %26 = vector.load %arg4[%c0_33, %c0_34] : memref<1x8xf32, #tpu.memory_space<vmem>>, vector<1x8xf32>
    %c0_35 = arith.constant 0 : index
    %c0_36 = arith.constant 0 : index
    %27 = vector.load %arg5[%c0_35, %c0_36] : memref<128x8xf32, #tpu.memory_space<vmem>>, vector<128x8xf32>
    %c0_37 = arith.constant 0 : index
    %c0_38 = arith.constant 0 : index
    %28 = vector.load %arg6[%c0_37, %c0_38] : memref<8x128xf32, #tpu.memory_space<vmem>>, vector<8x128xf32>
    %cst_39 = arith.constant dense<0.000000e+00> : vector<128xf32>
    %29 = vector.multi_reduction <add>, %24, %cst_39 [0] : vector<32x128xf32> to vector<128xf32>
    %30 = vector.shape_cast %29 : vector<128xf32> to vector<1x128xf32>
    %cst_40 = arith.constant dense<0.000000e+00> : vector<1x8xf32>
    %31 = tpu.matmul %30, %27, %cst_40 {dimension_numbers = #tpu.dot_dimension_numbers<[1], [0], [0], [1], [0, 0, 1, 1], [], []>} : vector<1x128xf32>, vector<128x8xf32>, vector<1x8xf32> -> vector<1x8xf32>
    %cst_41 = arith.constant 0.001953125 : f32
    %32 = vector.broadcast %cst_41 : f32 to vector<1x8xf32>
    %33 = arith.mulf %31, %32 : vector<1x8xf32>
    %cst_42 = arith.constant dense<0.000000e+00> : vector<1x128xf32>
    %34 = tpu.matmul %33, %28, %cst_42 {dimension_numbers = #tpu.dot_dimension_numbers<[1], [0], [0], [1], [0, 0, 1, 1], [], []>} : vector<1x8xf32>, vector<8x128xf32>, vector<1x128xf32> -> vector<1x128xf32>
    %35 = vector.broadcast %34 : vector<1x128xf32> to vector<32x128xf32>
    %36 = arith.subf %24, %35 : vector<32x128xf32>
    %37 = arith.mulf %36, %36 : vector<32x128xf32>
    %cst_43 = arith.constant dense<0.000000e+00> : vector<128xf32>
    %38 = vector.multi_reduction <add>, %37, %cst_43 [0] : vector<32x128xf32> to vector<128xf32>
    %39 = vector.shape_cast %38 : vector<128xf32> to vector<1x128xf32>
    %cst_44 = arith.constant dense<0.000000e+00> : vector<1x8xf32>
    %40 = tpu.matmul %39, %27, %cst_44 {dimension_numbers = #tpu.dot_dimension_numbers<[1], [0], [0], [1], [0, 0, 1, 1], [], []>} : vector<1x128xf32>, vector<128x8xf32>, vector<1x8xf32> -> vector<1x8xf32>
    %cst_45 = arith.constant 0.001953125 : f32
    %41 = vector.broadcast %cst_45 : f32 to vector<1x8xf32>
    %42 = arith.mulf %40, %41 : vector<1x8xf32>
    %cst_46 = arith.constant 9.99999974E-6 : f32
    %43 = vector.broadcast %cst_46 : f32 to vector<1x8xf32>
    %44 = arith.addf %42, %43 : vector<1x8xf32>
    %45 = math.rsqrt %44 : vector<1x8xf32>
    %46 = arith.mulf %25, %45 : vector<1x8xf32>
    %cst_47 = arith.constant dense<0.000000e+00> : vector<1x128xf32>
    %47 = tpu.matmul %46, %28, %cst_47 {dimension_numbers = #tpu.dot_dimension_numbers<[1], [0], [0], [1], [0, 0, 1, 1], [], []>} : vector<1x8xf32>, vector<8x128xf32>, vector<1x128xf32> -> vector<1x128xf32>
    %cst_48 = arith.constant dense<0.000000e+00> : vector<1x128xf32>
    %48 = tpu.matmul %26, %28, %cst_48 {dimension_numbers = #tpu.dot_dimension_numbers<[1], [0], [0], [1], [0, 0, 1, 1], [], []>} : vector<1x8xf32>, vector<8x128xf32>, vector<1x128xf32> -> vector<1x128xf32>
    %49 = vector.broadcast %47 : vector<1x128xf32> to vector<32x128xf32>
    %50 = arith.mulf %36, %49 : vector<32x128xf32>
    %51 = vector.broadcast %48 : vector<1x128xf32> to vector<32x128xf32>
    %52 = arith.addf %50, %51 : vector<32x128xf32>
    %cst_49 = arith.constant 0.000000e+00 : f32
    %53 = vector.broadcast %cst_49 : f32 to vector<2x1x128xf32>
    %c0_50 = arith.constant 0 : index
    %c0_51 = arith.constant 0 : index
    %c0_52 = arith.constant 0 : index
    %54 = vector.load %arg14[%c0_50, %c0_51, %c0_52] : memref<2x18x128xf32, #tpu.memory_space<vmem>>, vector<2x1x128xf32>
    tpu.vector_store %arg14[%c0_50, %c0_51, %c0_52], %53 {strides = array<i32>} : memref<2x18x128xf32, #tpu.memory_space<vmem>>, vector<2x1x128xf32>,
    %cst_53 = arith.constant 0.000000e+00 : f32
    %55 = vector.broadcast %cst_53 : f32 to vector<2x1x128xf32>
    %c0_54 = arith.constant 0 : index
    %c17_55 = arith.constant 17 : index
    %c0_56 = arith.constant 0 : index
    %56 = vector.load %arg14[%c0_54, %c17_55, %c0_56] : memref<2x18x128xf32, #tpu.memory_space<vmem>>, vector<2x1x128xf32>
    tpu.vector_store %arg14[%c0_54, %c17_55, %c0_56], %55 {strides = array<i32>} : memref<2x18x128xf32, #tpu.memory_space<vmem>>, vector<2x1x128xf32>,
    %57 = vector.shape_cast %52 : vector<32x128xf32> to vector<2x16x128xf32>
    %c0_57 = arith.constant 0 : index
    %c1_58 = arith.constant 1 : index
    %c0_59 = arith.constant 0 : index
    %58 = vector.load %arg14[%c0_57, %c1_58, %c0_59] : memref<2x18x128xf32, #tpu.memory_space<vmem>>, vector<2x16x128xf32>
    tpu.vector_store %arg14[%c0_57, %c1_58, %c0_59], %57 {strides = array<i32>} : memref<2x18x128xf32, #tpu.memory_space<vmem>>, vector<2x16x128xf32>,
    %cst_60 = arith.constant 0.000000e+00 : f32
    %59 = vector.broadcast %cst_60 : f32 to vector<32x128xf32>
    %c0_61 = arith.constant 0 : index
    %c0_62 = arith.constant 0 : index
    %c0_63 = arith.constant 0 : index
    %60 = vector.load %arg14[%c0_61, %c0_62, %c0_63] : memref<2x18x128xf32, #tpu.memory_space<vmem>>, vector<2x16x128xf32>
    %61 = vector.shape_cast %60 : vector<2x16x128xf32> to vector<32x128xf32>
    %c0_64 = arith.constant 0 : index
    %c0_65 = arith.constant 0 : index
    %c0_66 = arith.constant 0 : index
    %62 = vector.load %arg7[%c0_64, %c0_65, %c0_66] : memref<3x128x128xf32, #tpu.memory_space<vmem>>, vector<1x128x128xf32>
    %63 = vector.shape_cast %62 : vector<1x128x128xf32> to vector<128x128xf32>
    %cst_67 = arith.constant dense<0.000000e+00> : vector<32x128xf32>
    %64 = tpu.matmul %61, %63, %cst_67 {dimension_numbers = #tpu.dot_dimension_numbers<[1], [0], [0], [1], [0, 0, 1, 1], [], []>} : vector<32x128xf32>, vector<128x128xf32>, vector<32x128xf32> -> vector<32x128xf32>
    %65 = arith.addf %59, %64 : vector<32x128xf32>
    %c0_68 = arith.constant 0 : index
    %c1_69 = arith.constant 1 : index
    %c0_70 = arith.constant 0 : index
    %66 = vector.load %arg14[%c0_68, %c1_69, %c0_70] : memref<2x18x128xf32, #tpu.memory_space<vmem>>, vector<2x16x128xf32>
    %67 = vector.shape_cast %66 : vector<2x16x128xf32> to vector<32x128xf32>
    %c1_71 = arith.constant 1 : index
    %c0_72 = arith.constant 0 : index
    %c0_73 = arith.constant 0 : index
    %68 = vector.load %arg7[%c1_71, %c0_72, %c0_73] : memref<3x128x128xf32, #tpu.memory_space<vmem>>, vector<1x128x128xf32>
    %69 = vector.shape_cast %68 : vector<1x128x128xf32> to vector<128x128xf32>
    %cst_74 = arith.constant dense<0.000000e+00> : vector<32x128xf32>
    %70 = tpu.matmul %67, %69, %cst_74 {dimension_numbers = #tpu.dot_dimension_numbers<[1], [0], [0], [1], [0, 0, 1, 1], [], []>} : vector<32x128xf32>, vector<128x128xf32>, vector<32x128xf32> -> vector<32x128xf32>
    %71 = arith.addf %65, %70 : vector<32x128xf32>
    %c0_75 = arith.constant 0 : index
    %c2_76 = arith.constant 2 : index
    %c0_77 = arith.constant 0 : index
    %72 = vector.load %arg14[%c0_75, %c2_76, %c0_77] : memref<2x18x128xf32, #tpu.memory_space<vmem>>, vector<2x16x128xf32>
    %73 = vector.shape_cast %72 : vector<2x16x128xf32> to vector<32x128xf32>
    %c2_78 = arith.constant 2 : index
    %c0_79 = arith.constant 0 : index
    %c0_80 = arith.constant 0 : index
    %74 = vector.load %arg7[%c2_78, %c0_79, %c0_80] : memref<3x128x128xf32, #tpu.memory_space<vmem>>, vector<1x128x128xf32>
    %75 = vector.shape_cast %74 : vector<1x128x128xf32> to vector<128x128xf32>
    %cst_81 = arith.constant dense<0.000000e+00> : vector<32x128xf32>
    %76 = tpu.matmul %73, %75, %cst_81 {dimension_numbers = #tpu.dot_dimension_numbers<[1], [0], [0], [1], [0, 0, 1, 1], [], []>} : vector<32x128xf32>, vector<128x128xf32>, vector<32x128xf32> -> vector<32x128xf32>
    %77 = arith.addf %71, %76 : vector<32x128xf32>
    %78 = vector.shape_cast %0 : vector<2x16x128xf32> to vector<32x128xf32>
    %79 = arith.addf %77, %78 : vector<32x128xf32>
    %c0_82 = arith.constant 0 : index
    %c0_83 = arith.constant 0 : index
    %80 = vector.load %arg8[%c0_82, %c0_83] : memref<1x8xf32, #tpu.memory_space<vmem>>, vector<1x8xf32>
    %c0_84 = arith.constant 0 : index
    %c0_85 = arith.constant 0 : index
    %81 = vector.load %arg9[%c0_84, %c0_85] : memref<1x8xf32, #tpu.memory_space<vmem>>, vector<1x8xf32>
    %c0_86 = arith.constant 0 : index
    %c0_87 = arith.constant 0 : index
    %82 = vector.load %arg10[%c0_86, %c0_87] : memref<128x8xf32, #tpu.memory_space<vmem>>, vector<128x8xf32>
    %c0_88 = arith.constant 0 : index
    %c0_89 = arith.constant 0 : index
    %83 = vector.load %arg11[%c0_88, %c0_89] : memref<8x128xf32, #tpu.memory_space<vmem>>, vector<8x128xf32>
    %cst_90 = arith.constant dense<0.000000e+00> : vector<128xf32>
    %84 = vector.multi_reduction <add>, %79, %cst_90 [0] : vector<32x128xf32> to vector<128xf32>
    %85 = vector.shape_cast %84 : vector<128xf32> to vector<1x128xf32>
    %cst_91 = arith.constant dense<0.000000e+00> : vector<1x8xf32>
    %86 = tpu.matmul %85, %82, %cst_91 {dimension_numbers = #tpu.dot_dimension_numbers<[1], [0], [0], [1], [0, 0, 1, 1], [], []>} : vector<1x128xf32>, vector<128x8xf32>, vector<1x8xf32> -> vector<1x8xf32>
    %cst_92 = arith.constant 0.001953125 : f32
    %87 = vector.broadcast %cst_92 : f32 to vector<1x8xf32>
    %88 = arith.mulf %86, %87 : vector<1x8xf32>
    %cst_93 = arith.constant dense<0.000000e+00> : vector<1x128xf32>
    %89 = tpu.matmul %88, %83, %cst_93 {dimension_numbers = #tpu.dot_dimension_numbers<[1], [0], [0], [1], [0, 0, 1, 1], [], []>} : vector<1x8xf32>, vector<8x128xf32>, vector<1x128xf32> -> vector<1x128xf32>
    %90 = vector.broadcast %89 : vector<1x128xf32> to vector<32x128xf32>
    %91 = arith.subf %79, %90 : vector<32x128xf32>
    %92 = arith.mulf %91, %91 : vector<32x128xf32>
    %cst_94 = arith.constant dense<0.000000e+00> : vector<128xf32>
    %93 = vector.multi_reduction <add>, %92, %cst_94 [0] : vector<32x128xf32> to vector<128xf32>
    %94 = vector.shape_cast %93 : vector<128xf32> to vector<1x128xf32>
    %cst_95 = arith.constant dense<0.000000e+00> : vector<1x8xf32>
    %95 = tpu.matmul %94, %82, %cst_95 {dimension_numbers = #tpu.dot_dimension_numbers<[1], [0], [0], [1], [0, 0, 1, 1], [], []>} : vector<1x128xf32>, vector<128x8xf32>, vector<1x8xf32> -> vector<1x8xf32>
    %cst_96 = arith.constant 0.001953125 : f32
    %96 = vector.broadcast %cst_96 : f32 to vector<1x8xf32>
    %97 = arith.mulf %95, %96 : vector<1x8xf32>
    %cst_97 = arith.constant 9.99999974E-6 : f32
    %98 = vector.broadcast %cst_97 : f32 to vector<1x8xf32>
    %99 = arith.addf %97, %98 : vector<1x8xf32>
    %100 = math.rsqrt %99 : vector<1x8xf32>
    %101 = arith.mulf %80, %100 : vector<1x8xf32>
    %cst_98 = arith.constant dense<0.000000e+00> : vector<1x128xf32>
    %102 = tpu.matmul %101, %83, %cst_98 {dimension_numbers = #tpu.dot_dimension_numbers<[1], [0], [0], [1], [0, 0, 1, 1], [], []>} : vector<1x8xf32>, vector<8x128xf32>, vector<1x128xf32> -> vector<1x128xf32>
    %cst_99 = arith.constant dense<0.000000e+00> : vector<1x128xf32>
    %103 = tpu.matmul %81, %83, %cst_99 {dimension_numbers = #tpu.dot_dimension_numbers<[1], [0], [0], [1], [0, 0, 1, 1], [], []>} : vector<1x8xf32>, vector<8x128xf32>, vector<1x128xf32> -> vector<1x128xf32>
    %104 = vector.broadcast %102 : vector<1x128xf32> to vector<32x128xf32>
    %105 = arith.mulf %91, %104 : vector<32x128xf32>
    %106 = vector.broadcast %103 : vector<1x128xf32> to vector<32x128xf32>
    %107 = arith.addf %105, %106 : vector<32x128xf32>
    %108 = vector.shape_cast %107 : vector<32x128xf32> to vector<2x16x128xf32>
    %c0_100 = arith.constant 0 : index
    %c0_101 = arith.constant 0 : index
    %c0_102 = arith.constant 0 : index
    %109 = vector.load %arg12[%c0_100, %c0_101, %c0_102] : memref<2x16x128xf32, #tpu.memory_space<vmem>>, vector<2x16x128xf32>
    tpu.vector_store %arg12[%c0_100, %c0_101, %c0_102], %108 {strides = array<i32>} : memref<2x16x128xf32, #tpu.memory_space<vmem>>, vector<2x16x128xf32>,
    return
  }
  func.func @transform_0(%arg0: i32) -> (i32, i32, i32) {
    %c0_i32 = arith.constant 0 : i32
    %c0_i32_0 = arith.constant 0 : i32
    %c0_i32_1 = arith.constant 0 : i32
    %c0_i32_2 = arith.constant 0 : i32
    return %c0_i32, %c0_i32_0, %c0_i32_1 : i32, i32, i32
  }
  func.func @transform_1(%arg0: i32) -> (i32, i32, i32) {
    %c0_i32 = arith.constant 0 : i32
    %c0_i32_0 = arith.constant 0 : i32
    %c0_i32_1 = arith.constant 0 : i32
    %c0_i32_2 = arith.constant 0 : i32
    return %c0_i32, %c0_i32_0, %c0_i32_1 : i32, i32, i32
  }
  func.func @transform_2(%arg0: i32) -> (i32, i32) {
    %c0_i32 = arith.constant 0 : i32
    %c0_i32_0 = arith.constant 0 : i32
    %c0_i32_1 = arith.constant 0 : i32
    return %c0_i32, %c0_i32_0 : i32, i32
  }
  func.func @transform_3(%arg0: i32) -> (i32, i32) {
    %c0_i32 = arith.constant 0 : i32
    %c0_i32_0 = arith.constant 0 : i32
    %c0_i32_1 = arith.constant 0 : i32
    return %c0_i32, %c0_i32_0 : i32, i32
  }
  func.func @transform_4(%arg0: i32) -> (i32, i32) {
    %c0_i32 = arith.constant 0 : i32
    %c0_i32_0 = arith.constant 0 : i32
    %c0_i32_1 = arith.constant 0 : i32
    return %c0_i32, %c0_i32_0 : i32, i32
  }
  func.func @transform_5(%arg0: i32) -> (i32, i32) {
    %c0_i32 = arith.constant 0 : i32
    %c0_i32_0 = arith.constant 0 : i32
    %c0_i32_1 = arith.constant 0 : i32
    return %c0_i32, %c0_i32_0 : i32, i32
  }
  func.func @transform_6(%arg0: i32) -> (i32, i32, i32) {
    %c0_i32 = arith.constant 0 : i32
    %c0_i32_0 = arith.constant 0 : i32
    %c0_i32_1 = arith.constant 0 : i32
    %c0_i32_2 = arith.constant 0 : i32
    return %c0_i32, %c0_i32_0, %c0_i32_1 : i32, i32, i32
  }
  func.func @transform_7(%arg0: i32) -> (i32, i32) {
    %c0_i32 = arith.constant 0 : i32
    %c0_i32_0 = arith.constant 0 : i32
    %c0_i32_1 = arith.constant 0 : i32
    return %c0_i32, %c0_i32_0 : i32, i32
  }
  func.func @transform_8(%arg0: i32) -> (i32, i32) {
    %c0_i32 = arith.constant 0 : i32
    %c0_i32_0 = arith.constant 0 : i32
    %c0_i32_1 = arith.constant 0 : i32
    return %c0_i32, %c0_i32_0 : i32, i32
  }
  func.func @transform_9(%arg0: i32) -> (i32, i32) {
    %c0_i32 = arith.constant 0 : i32
    %c0_i32_0 = arith.constant 0 : i32
    %c0_i32_1 = arith.constant 0 : i32
    return %c0_i32, %c0_i32_0 : i32, i32
  }
  func.func @transform_10(%arg0: i32) -> (i32, i32) {
    %c0_i32 = arith.constant 0 : i32
    %c0_i32_0 = arith.constant 0 : i32
    %c0_i32_1 = arith.constant 0 : i32
    return %c0_i32, %c0_i32_0 : i32, i32
  }
  func.func @transform_11(%arg0: i32) -> (i32, i32, i32) {
    %c0_i32 = arith.constant 0 : i32
    %c0_i32_0 = arith.constant 0 : i32
    %c0_i32_1 = arith.constant 0 : i32
    %c0_i32_2 = arith.constant 0 : i32
    return %c0_i32, %c0_i32_0, %c0_i32_1 : i32, i32, i32
  }
}

</mosaic_0001>

<bundles_post_ra>
// kernel: tpu_custom_call.1
= control target key start
LH: loop header
LB: loop body
LE: loop exit
PB: predicated region body
PF: predicated region fallthrough
CT: control target
= control target key end

     0   :  { %16 = vsyncpa [#allocation5], 0  ;;  %s2990_s0 = inlined_call_operand.vmem [shape: f32[2,16,128], index: 0, kind: input, shape index: {}]   ;;  %s2991_s1 = inlined_call_operand.hbm [shape: f32[3,128,128], index: 1, kind: input, shape index: {}]   ;;  %s2992_s2 = inlined_call_operand.vmem [shape: f32[1,8], index: 2, kind: input, shape index: {}]   ;;  %s2993_s3 = inlined_call_operand.vmem [shape: f32[1,8], index: 3, kind: input, shape index: {}]   ;;  %s2994_s4 = inlined_call_operand.vmem [shape: f32[128,8], index: 4, kind: input, shape index: {}]   ;;  %s2995_s5 = inlined_call_operand.vmem [shape: f32[8,128], index: 5, kind: input, shape index: {}]   ;;  %s2996_s6 = inlined_call_operand.hbm [shape: f32[3,128,128], index: 6, kind: input, shape index: {}]   ;;  %s2997_s7 = inlined_call_operand.vmem [shape: f32[1,8], index: 7, kind: input, shape index: {}]   ;;  %s2998_s8 = inlined_call_operand.vmem [shape: f32[1,8], index: 8, kind: input, shape index: {}]   ;;  %s2999_s9 = inlined_call_operand.vmem [shape: f32[128,8], index: 9, kind: input, shape index: {}]   ;;  %s3000_s10 = inlined_call_operand.vmem [shape: f32[8,128], index: 10, kind: input, shape index: {}]   ;;  %s3001_s11 = inlined_call_operand.hbm [shape: f32[2,16,128], index: 11, kind: output, shape index: {}]  }
   0x1   :  { %17 = vsyncpa [#allocation8], 0 }
   0x2   :  { %18 = vsyncpa [#allocation6], 0  ;;  %s2606_s17 = smov [#allocation4]   ;;  %s2534_s21 = scalar_lea.hbm %s2991_s1, 6144 }
   0x3   :  { %s26_s18 = sshll.u32 %s2606_s17, 4  ;;  %p2535_p0 = scmp.ne.s32.totalorder %s2991_s1, %s2534_s21  ;;  %s27_s18 = int_to_ptr.vmem [resolvable:$true] %s26_s18 }
   0x4   :  { %p2538_p1 = scmp.lt.u32.totalorder %s2534_s21, %s2991_s1 }
   0x6   :  { %p2540_p2 = pnand %p2538_p1, %p2535_p0 }
   0x8   :  { %2543 = shalt.err (!%p2540_p2)
}
   0x9   :  { %s2544_s26 = scalar_lea.vmem %s27_s18, 6144  ;;  %p2549_p4 = scmp.lt.s32.totalorder %s27_s18, %s27_s18 }
   0xa   :  { %p2545_p3 = scmp.ne.s32.totalorder %s27_s18, %s2544_s26  ;;  %p2550_p5 = scmp.lt.s32.totalorder %s2544_s26, %s2544_s26 }
   0xc   :  { %p2551_p6 = por %p2550_p5, %p2549_p4 }
   0xe   :  { %p2552_p7 = pnand %p2551_p6, %p2545_p3 }
  0x10   :  { %2555 = shalt.err (!%p2552_p7)
}
  0x11   :  { %s2607_s27 = smov 128   ;;  %s2608_s28 = smov 8  }
  0x12   :  { %32 = dma.hbm_to_vmem [thread:$0]  %s2991_s1, 6144, %s27_s18, [#allocation5], %s2607_s27, %s2607_s27, %s2608_s28  }
  0x13   :  { %s2609_s12 = smov [#allocation7]   ;;  %s2556_s16 = scalar_lea.hbm %s2996_s6, 6144 }
  0x14   :  { %s46_s13 = sshll.u32 %s2609_s12, 4  ;;  %p2557_p8 = scmp.ne.s32.totalorder %s2996_s6, %s2556_s16  ;;  %s47_s13 = int_to_ptr.vmem [resolvable:$true] %s46_s13 }
  0x15   :  { %p2560_p9 = scmp.lt.u32.totalorder %s2556_s16, %s2996_s6 }
  0x17   :  { %p2562_p10 = pnand %p2560_p9, %p2557_p8 }
  0x19   :  { %2565 = shalt.err (!%p2562_p10)
}
  0x1a   :  { %s2566_s22 = scalar_lea.vmem %s47_s13, 6144  ;;  %p2571_p12 = scmp.lt.s32.totalorder %s47_s13, %s47_s13 }
  0x1b   :  { %p2567_p11 = scmp.ne.s32.totalorder %s47_s13, %s2566_s22  ;;  %p2572_p13 = scmp.lt.s32.totalorder %s2566_s22, %s2566_s22 }
  0x1d   :  { %p2573_p0 = por %p2572_p13, %p2571_p12 }
  0x1f   :  { %p2574_p1 = pnand %p2573_p0, %p2567_p11 }
  0x21   :  { %2577 = shalt.err (!%p2574_p1)
}
  0x22   :  { %52 = dma.hbm_to_vmem [thread:$0]  %s2996_s6, 6144, %s47_s13, [#allocation8], %s2607_s27, %s2607_s27, %s2608_s28  }
  0x23   :  { %2600 = dma.done.wait [#allocation5], 6144  }
  0x24   :  { %2601 = vsyncadd [#allocation5], 4294961152 }
  0x25   :  { %2602 = dma.done.wait [#allocation8], 6144  }
  0x26   :  { %2603 = vsyncadd [#allocation8], 4294961152  ;;  %v2610_v0 = vmov 0.0   ;;  %v2611_v1 = vmov 0.0|0.0   ;;  %v104_v2 = vld [vmem:[#allocation4 + $0x80] sm:$0xff]  ;;  %v105_v3 = vld [vmem:[#allocation4 + $0x88] sm:$0xff] }
  0x27   :  { %71 = vst [vmem:[#allocation2] sm:$0x1] %v2610_v0  ;;  %72 = vst [vmem:[#allocation2 + $0x18] sm:$0x1] %v2610_v0  ;;  %2314 = vmatprep.subr.bf16.mxu1 %v2611_v1  ;;  %v106_v4 = vld [vmem:[#allocation4 + $0x90] sm:$0xff]  ;;  %v2218_v5 = vpack.c.bf16 %v105_v3, %v104_v2  ;;  %v107_v6 = vld [vmem:[#allocation4 + $0x98] sm:$0xff] }
  0x28   :  { %73 = vst [vmem:[#allocation2 + $0x11] sm:$0x1] %v2610_v0  ;;  %74 = vst [vmem:[#allocation2 + $0x29] sm:$0x1] %v2610_v0  ;;  %v2222_v7 = vpack.c.bf16 %v107_v6, %v106_v4  ;;  %v108_v8 = vld [vmem:[#allocation4 + $0xa0] sm:$0xff]  ;;  %v109_v9 = vld [vmem:[#allocation4 + $0xa8] sm:$0xff] }
  0x29   :  { %830 = vst [vmem:[#allocation3] sm:$0x1] %v2610_v0  ;;  %831 = vst [vmem:[#allocation3 + $0x18] sm:$0x1] %v2610_v0  ;;  %2219 = vmatprep.subr.bf16.mxu0 %v2218_v5  ;;  %v2226_v10 = vpack.c.bf16 %v109_v9, %v108_v8  ;;  %v2716_v11 = vld [vmem:[%s2990_s0] sm:$0xff]  ;;  %v110_v12 = vld [vmem:[#allocation4 + $0xb0] sm:$0xff] }
  0x2a   :  { %832 = vst [vmem:[#allocation3 + $0x11] sm:$0x1] %v2610_v0  ;;  %833 = vst [vmem:[#allocation3 + $0x29] sm:$0x1] %v2610_v0  ;;  %2221 = vmatpush3.bf16.msra.mxu0 %v2218_v5  ;;  %v111_v13 = vld [vmem:[#allocation4 + $0xb8] sm:$0xff]  ;;  %1852 = vmatprep.mubr.f32.mxu0 %v2716_v11  ;;  %v2723_v14 = vld [vmem:[%s2990_s0 + $0x8] sm:$0xff] }
  0x2b   :  { %2223 = vmatprep.subr.bf16.mxu0 %v2222_v7  ;;  %75 = vst [vmem:[#allocation2 + $0x1] sm:$0xff] %v2716_v11  ;;  %76 = vst [vmem:[#allocation2 + $0x9] sm:$0xff] %v2723_v14  ;;  %v2230_v15 = vpack.c.bf16 %v111_v13, %v110_v12  ;;  %v112_v16 = vld [vmem:[#allocation4 + $0xc0] sm:$0xff]  ;;  %v113_v17 = vld [vmem:[#allocation4 + $0xc8] sm:$0xff]  ;;  %vm2612_vm0 = vmmov 0   ;;  %vm499_vm1 = vcmask 64512  }
  0x2c   :  { %v2729_v18 = vld [vmem:[%s2990_s0 + $0x10] sm:$0xff]  ;;  %v2735_v19 = vld [vmem:[%s2990_s0 + $0x18] sm:$0xff]  ;;  %v2234_v20 = vpack.c.bf16 %v113_v17, %v112_v16  ;;  %v116_v24 = vld [vmem:[#allocation4 + $0xe0] sm:$0xff]  ;;  %1966 = vmatprep.mubr.msk.f32.mxu1 %vm2612_vm0, %v2610_v0 }
  0x2d   :  { %77 = vst [vmem:[#allocation2 + $0x19] sm:$0xff] %v2729_v18  ;;  %78 = vst [vmem:[#allocation2 + $0x21] sm:$0xff] %v2735_v19  ;;  %v114_v21 = vld [vmem:[#allocation4 + $0xd0] sm:$0xff]  ;;  %v115_v22 = vld [vmem:[#allocation4 + $0xd8] sm:$0xff] }
  0x2e   :  { %2225 = vmatpush3.bf16.msra.mxu0 %v2222_v7  ;;  %v2238_v23 = vpack.c.bf16 %v115_v22, %v114_v21  ;;  %v117_v25 = vld [vmem:[#allocation4 + $0xe8] sm:$0xff]  ;;  %v402_v26 = vld [vmem:[%s2994_s4] sm:$0xff]  ;;  %v404_v28 = vld [vmem:[%s2994_s4 + $0x10] sm:$0xff] }
  0x2f   :  { %2227 = vmatprep.subr.bf16.mxu0 %v2226_v10  ;;  %v403_v27 = vld [vmem:[%s2994_s4 + $0x8] sm:$0xff]  ;;  %v2242_v29 = vpack.c.bf16 %v117_v25, %v116_v24  ;;  %v405_v31 = vld [vmem:[%s2994_s4 + $0x18] sm:$0xff]  ;;  %v118_v32 = vld [vmem:[#allocation4 + $0xf0] sm:$0xff] }
  0x30   :  { %v2747_v30 = vpack.c.bf16 %v403_v27, %v402_v26  ;;  %v119_v33 = vld [vmem:[#allocation4 + $0xf8] sm:$0xff]  ;;  %v2753_v34 = vpack.c.bf16 %v405_v31, %v404_v28  ;;  %v406_v35 = vld [vmem:[%s2994_s4 + $0x20] sm:$0xff]  ;;  %v407_v36 = vld [vmem:[%s2994_s4 + $0x28] sm:$0xff] }
  0x31   :  { %v2246_v37 = vpack.c.bf16 %v119_v33, %v118_v32  ;;  %v83_v38 = vld [vmem:[#allocation4] sm:$0xff]  ;;  %v84_v39 = vld [vmem:[#allocation4 + $0x8] sm:$0xff]  ;;  %v2763_v40 = vpack.c.bf16 %v407_v36, %v406_v35  ;;  %v85_v42 = vld [vmem:[#allocation4 + $0x10] sm:$0xff] }
  0x32   :  { %2229 = vmatpush3.bf16.msra.mxu0 %v2226_v10  ;;  %2316 = vmatpush3.bf16.msra.mxu1 %v2747_v30  ;;  %v2250_v41 = vpack.c.bf16 %v84_v39, %v83_v38  ;;  %v86_v43 = vld [vmem:[#allocation4 + $0x18] sm:$0xff]  ;;  %v87_v45 = vld [vmem:[#allocation4 + $0x20] sm:$0xff]  ;;  %v88_v46 = vld [vmem:[#allocation4 + $0x28] sm:$0xff] }
  0x33   :  { %2231 = vmatprep.subr.bf16.mxu0 %v2230_v15  ;;  %2317 = vmatprep.subr.bf16.mxu1 %v2611_v1  ;;  %v2254_v44 = vpack.c.bf16 %v86_v43, %v85_v42  ;;  %v2258_v47 = vpack.c.bf16 %v88_v46, %v87_v45  ;;  %v79_v48 = vld [vmem:[#allocation2] sm:$0xff]  ;;  %v89_v49 = vld [vmem:[#allocation4 + $0x30] sm:$0xff]  ;;  %v90_v50 = vld [vmem:[#allocation4 + $0x38] sm:$0xff] }
  0x34   :  { %v2262_v51 = vpack.c.bf16 %v90_v50, %v89_v49  ;;  %v91_v52 = vld [vmem:[#allocation4 + $0x40] sm:$0xff]  ;;  %v92_v53 = vld [vmem:[#allocation4 + $0x48] sm:$0xff]  ;;  %v93_v55 = vld [vmem:[#allocation4 + $0x50] sm:$0xff] }
  0x35   :  { %v2266_v54 = vpack.c.bf16 %v92_v53, %v91_v52  ;;  %v94_v56 = vld [vmem:[#allocation4 + $0x58] sm:$0xff]  ;;  %v95_v58 = vld [vmem:[#allocation4 + $0x60] sm:$0xff]  ;;  %v96_v59 = vld [vmem:[#allocation4 + $0x68] sm:$0xff] }
  0x36   :  { %2233 = vmatpush3.bf16.msra.mxu0 %v2230_v15  ;;  %2319 = vmatpush3.bf16.msra.mxu1 %v2753_v34  ;;  %v2270_v57 = vpack.c.bf16 %v94_v56, %v93_v55  ;;  %v2274_v60 = vpack.c.bf16 %v96_v59, %v95_v58  ;;  %v97_v61 = vld [vmem:[#allocation4 + $0x70] sm:$0xff]  ;;  %v98_v62 = vld [vmem:[#allocation4 + $0x78] sm:$0xff]  ;;  %v295_v2 = vld [vmem:[#allocation4 + $0x100] sm:$0xff] }
  0x37   :  { %2235 = vmatprep.subr.bf16.mxu0 %v2234_v20  ;;  %2320 = vmatprep.subr.bf16.mxu1 %v2611_v1  ;;  %v2278_v63 = vpack.c.bf16 %v98_v62, %v97_v61  ;;  %v296_v3 = vld [vmem:[#allocation4 + $0x108] sm:$0xff]  ;;  %v297_v5 = vld [vmem:[#allocation4 + $0x110] sm:$0xff]  ;;  %v298_v6 = vld [vmem:[#allocation4 + $0x118] sm:$0xff] }
  0x38   :  { %v2282_v4 = vpack.c.bf16 %v296_v3, %v295_v2  ;;  %v80_v7 = vld [vmem:[#allocation2 + $0x8] sm:$0xff]  ;;  %v2286_v8 = vpack.c.bf16 %v298_v6, %v297_v5  ;;  %v81_v9 = vld [vmem:[#allocation2 + $0x18] sm:$0xff]  ;;  %v299_v10 = vld [vmem:[#allocation4 + $0x120] sm:$0xff] }
  0x39   :  { %v300_v12 = vld [vmem:[#allocation4 + $0x128] sm:$0xff]  ;;  %v82_v13 = vld [vmem:[#allocation2 + $0x20] sm:$0xff]  ;;  %v301_v17 = vld [vmem:[#allocation4 + $0x130] sm:$0xff] }
  0x3a   :  { %2237 = vmatpush3.bf16.msra.mxu0 %v2234_v20  ;;  %2322 = vmatpush3.bf16.msra.mxu1 %v2763_v40  ;;  %v2290_v15 = vpack.c.bf16 %v300_v12, %v299_v10  ;;  %v290_v16 = vld [vmem:[#allocation2 + $0x2] sm:$0xff]  ;;  %v302_v20 = vld [vmem:[#allocation4 + $0x138] sm:$0xff]  ;;  %v305_v25 = vld [vmem:[#allocation4 + $0x150] sm:$0xff] }
  0x3b   :  { %2239 = vmatprep.subr.bf16.mxu0 %v2238_v23  ;;  %2323 = vmatprep.subr.bf16.mxu1 %v2611_v1  ;;  %v2294_v21 = vpack.c.bf16 %v302_v20, %v301_v17  ;;  %v303_v22 = vld [vmem:[#allocation4 + $0x140] sm:$0xff]  ;;  %v306_v26 = vld [vmem:[#allocation4 + $0x158] sm:$0xff]  ;;  %v309_v32 = vld [vmem:[#allocation4 + $0x170] sm:$0xff] }
  0x3c   :  { %v2302_v27 = vpack.c.bf16 %v306_v26, %v305_v25  ;;  %v307_v28 = vld [vmem:[#allocation4 + $0x160] sm:$0xff]  ;;  %v310_v33 = vld [vmem:[#allocation4 + $0x178] sm:$0xff]  ;;  %v291_v36 = vld [vmem:[#allocation2 + $0xa] sm:$0xff] }
  0x3d   :  { %v2310_v35 = vpack.c.bf16 %v310_v33, %v309_v32  ;;  %v293_v38 = vld [vmem:[#allocation2 + $0x22] sm:$0xff]  ;;  %v408_v39 = vld [vmem:[%s2994_s4 + $0x30] sm:$0xff]  ;;  %v417_v53 = vld [vmem:[%s2994_s4 + $0x78] sm:$0xff] }
  0x3e   :  { %2241 = vmatpush3.bf16.msra.mxu0 %v2238_v23  ;;  %v304_v23 = vld [vmem:[#allocation4 + $0x148] sm:$0xff]  ;;  %v410_v43 = vld [vmem:[%s2994_s4 + $0x40] sm:$0xff]  ;;  %v412_v46 = vld [vmem:[%s2994_s4 + $0x50] sm:$0xff] }
  0x3f   :  { %2243 = vmatprep.subr.bf16.mxu0 %v2242_v29  ;;  %v2298_v24 = vpack.c.bf16 %v304_v23, %v303_v22  ;;  %v414_v49 = vld [vmem:[%s2994_s4 + $0x60] sm:$0xff]  ;;  %v415_v50 = vld [vmem:[%s2994_s4 + $0x68] sm:$0xff]  ;;  %v416_v52 = vld [vmem:[%s2994_s4 + $0x70] sm:$0xff] }
  0x40   :  { %v2814_v6 = vld [vmem:[%s2995_s5] sm:$0xff] }
  0x42   :  { %2245 = vmatpush3.bf16.msra.mxu0 %v2242_v29  ;;  %v308_v29 = vld [vmem:[#allocation4 + $0x168] sm:$0xff] }
  0x43   :  { %2247 = vmatprep.subr.bf16.mxu0 %v2246_v37  ;;  %v2306_v31 = vpack.c.bf16 %v308_v29, %v307_v28 }
  0x46   :  { %2249 = vmatpush3.bf16.msra.mxu0 %v2246_v37  ;;  %v292_v37 = vld [vmem:[#allocation2 + $0x1a] sm:$0xff] }
  0x47   :  { %2251 = vmatprep.subr.bf16.mxu0 %v2250_v41 }
  0x49   :  { %1853 = vmatmul.mubr.f32.vlgmr.msra.gmra.mrb[0].mxu0 %v2723_v14 }
  0x4a   :  { %2253 = vmatpush3.bf16.msra.mxu0 %v2250_v41  ;;  %1855 = vmatprep.mubr.f32.mxu0 %v2729_v18  ;;  %v409_v41 = vld [vmem:[%s2994_s4 + $0x38] sm:$0xff] }
  0x4b   :  { %2255 = vmatprep.subr.bf16.mxu0 %v2254_v44  ;;  %v2324_v42 = vpack.c.bf16 %v409_v41, %v408_v39  ;;  %v400_v41 = vld [vmem:[%s2992_s2] sm:$0x1] }
  0x4d   :  { %1856 = vmatmul.mubr.f32.gmra.mrb[2].mxu0 %v2735_v19  ;;  %2325 = vmatpush3.bf16.msra.mxu1 %v2324_v42 }
  0x4e   :  { %2257 = vmatpush3.bf16.msra.mxu0 %v2254_v44  ;;  %1890 = vmatprep.mubr.f32.mxu0 %v79_v48  ;;  %v411_v44 = vld [vmem:[%s2994_s4 + $0x48] sm:$0xff] }
  0x4f   :  { %2259 = vmatprep.subr.bf16.mxu0 %v2258_v47  ;;  %2326 = vmatprep.subr.bf16.mxu1 %v2611_v1  ;;  %v2327_v45 = vpack.c.bf16 %v411_v44, %v410_v43  ;;  %v864_v43 = vld [vmem:[#allocation7 + $0x88] sm:$0xff] }
  0x51   :  { %2328 = vmatpush3.bf16.msra.mxu1 %v2327_v45 }
  0x52   :  { %2261 = vmatpush3.bf16.msra.mxu0 %v2258_v47  ;;  %2329 = vmatprep.subr.bf16.mxu1 %v2611_v1  ;;  %v413_v47 = vld [vmem:[%s2994_s4 + $0x58] sm:$0xff] }
  0x53   :  { %2263 = vmatprep.subr.bf16.mxu0 %v2262_v51  ;;  %v2330_v48 = vpack.c.bf16 %v413_v47, %v412_v46  ;;  %v865_v47 = vld [vmem:[#allocation7 + $0x90] sm:$0xff] }
  0x55   :  { %2331 = vmatpush3.bf16.msra.mxu1 %v2330_v48 }
  0x56   :  { %2265 = vmatpush3.bf16.msra.mxu0 %v2262_v51  ;;  %2332 = vmatprep.subr.bf16.mxu1 %v2611_v1  ;;  %v2333_v51 = vpack.c.bf16 %v415_v50, %v414_v49  ;;  %v401_v49 = vld [vmem:[%s2993_s3] sm:$0x1] }
  0x57   :  { %2267 = vmatprep.subr.bf16.mxu0 %v2266_v54 }
  0x59   :  { %2334 = vmatpush3.bf16.msra.mxu1 %v2333_v51 }
  0x5a   :  { %2269 = vmatpush3.bf16.msra.mxu0 %v2266_v54  ;;  %v2336_v54 = vpack.c.bf16 %v417_v53, %v416_v52  ;;  %2335 = vmatprep.subr.bf16.mxu1 %v2611_v1  ;;  %v868_v52 = vld [vmem:[#allocation7 + $0xa8] sm:$0xff] }
  0x5b   :  { %2271 = vmatprep.subr.bf16.mxu0 %v2270_v57 }
  0x5d   :  { %2337 = vmatpush3.bf16.msra.mxu1 %v2336_v54 }
  0x5e   :  { %2273 = vmatpush3.bf16.msra.mxu0 %v2270_v57  ;;  %1969 = vmatprep.subr.mxu1 %v2610_v0 }
  0x5f   :  { %2275 = vmatprep.subr.bf16.mxu0 %v2274_v60 }
  0x62   :  { %2277 = vmatpush3.bf16.msra.mxu0 %v2274_v60 }
  0x63   :  { %2279 = vmatprep.subr.bf16.mxu0 %v2278_v63 }
  0x66   :  { %2281 = vmatpush3.bf16.msra.mxu0 %v2278_v63 }
  0x67   :  { %2283 = vmatprep.subr.bf16.mxu0 %v2282_v4 }
  0x69   :  { %1891 = vmatmul.mubr.f32.vlgmr.msra.gmra.mrb[0].mxu0 %v80_v7 }
  0x6a   :  { %2285 = vmatpush3.bf16.msra.mxu0 %v2282_v4  ;;  %1893 = vmatprep.mubr.f32.mxu0 %v81_v9 }
  0x6b   :  { %2287 = vmatprep.subr.bf16.mxu0 %v2286_v8 }
  0x6d   :  { %1894 = vmatmul.mubr.f32.gmra.mrb[2].mxu0 %v82_v13 }
  0x6e   :  { %2289 = vmatpush3.bf16.msra.mxu0 %v2286_v8  ;;  %1928 = vmatprep.mubr.f32.mxu0 %v290_v16 }
  0x6f   :  { %2291 = vmatprep.subr.bf16.mxu0 %v2290_v15 }
  0x72   :  { %2293 = vmatpush3.bf16.msra.mxu0 %v2290_v15 }
  0x73   :  { %2295 = vmatprep.subr.bf16.mxu0 %v2294_v21 }
  0x76   :  { %2297 = vmatpush3.bf16.msra.mxu0 %v2294_v21 }
  0x77   :  { %2299 = vmatprep.subr.bf16.mxu0 %v2298_v24 }
  0x7a   :  { %2301 = vmatpush3.bf16.msra.mxu0 %v2298_v24 }
  0x7b   :  { %2303 = vmatprep.subr.bf16.mxu0 %v2302_v27 }
  0x7e   :  { %2305 = vmatpush3.bf16.msra.mxu0 %v2302_v27 }
  0x7f   :  { %2307 = vmatprep.subr.bf16.mxu0 %v2306_v31 }
  0x82   :  { %2309 = vmatpush3.bf16.msra.mxu0 %v2306_v31 }
  0x83   :  { %2311 = vmatprep.subr.bf16.mxu0 %v2310_v35 }
  0x86   :  { %2313 = vmatpush3.bf16.msra.mxu0 %v2310_v35 }
  0x87   :  { %2458 = vmatprep.subr.bf16.mxu0 %v2611_v1 }
  0x89   :  { %1929 = vmatmul.mubr.f32.vlgmr.msra.gmra.mrb[0].mxu0 %v291_v36 }
  0x8a   :  { %1931 = vmatprep.mubr.f32.mxu0 %v292_v37 }
  0x8d   :  { %1932 = vmatmul.mubr.f32.gmra.mrb[2].mxu0 %v293_v38 }
  0x8e   :  { %2165 = vmatprep.mubr.msk.f32.mxu0 %vm2612_vm0, %v2610_v0 }
 0x15c   :  { %v1930_v55 = vpop.f32.mrb[0].mxu0 }
 0x15d   :  { %v377_v56 = vpop.f32.mrb[1].mxu0 }
 0x15e   :  { %v419_v57 = vadd.f32 %v1930_v55, %v377_v56 }
 0x160   :  { %v1933_v58 = vpop.f32.mrb[2].mxu0 }
 0x161   :  { %v387_v59 = vpop.f32.mrb[3].mxu0 }
 0x162   :  { %v420_v60 = vadd.f32 %v419_v57, %v387_v59  ;;  %v871_v57 = vld [vmem:[#allocation7 + $0xc0] sm:$0xff] }
 0x164   :  { %v421_v61 = vadd.f32 %v1933_v58, %v420_v60  ;;  %v873_v60 = vld [vmem:[#allocation7 + $0xd0] sm:$0xff] }
 0x166   :  { %v422_v62 = vrot.slane %v421_v61, 4 }
 0x168   :  { %v423_v63 = vadd.f32 %v422_v62, %v421_v61  ;;  %v874_v61 = vld [vmem:[#allocation7 + $0xd8] sm:$0xff] }
 0x169   :  { %v2382_v62 = vpack.c.bf16 %v874_v61, %v873_v60  ;;  %v1056_v60 = vld [vmem:[#allocation7 + $0x110] sm:$0xff]  ;;  %v1057_v61 = vld [vmem:[#allocation7 + $0x118] sm:$0xff] }
 0x16a   :  { %v424_v2 = vrot.slane %v423_v63, 2 }
 0x16c   :  { %v425_v3 = vadd.f32 %v424_v2, %v423_v63  ;;  %v875_v63 = vld [vmem:[#allocation7 + $0xe0] sm:$0xff]  ;;  %v876_v2 = vld [vmem:[#allocation7 + $0xe8] sm:$0xff] }
 0x16e   :  { %v426_v4 = vrot.slane %v425_v3, 1 }
 0x170   :  { %v427_v5 = vadd.f32 %v426_v4, %v425_v3  ;;  %v2386_v3 = vpack.c.bf16 %v876_v2, %v875_v63  ;;  %v877_v4 = vld [vmem:[#allocation7 + $0xf0] sm:$0xff]  ;;  %v1058_v2 = vld [vmem:[#allocation7 + $0x120] sm:$0xff] }
 0x172   :  { %1967 = vmatmul.mubr.f32.vlgmr.msra.gmra.mrb[0].mxu1 %v427_v5  ;;  %v878_v5 = vld [vmem:[#allocation7 + $0xf8] sm:$0xff] }
 0x173   :  { %1970 = vmatpush3.msra.mxu1 %v2814_v6  ;;  %1971 = vmatprep.mubr.msk.f32.mxu1 %vm2612_vm0, %v2610_v0 }
 0x174   :  { %2338 = vmatprep.subr.bf16.mxu1 %v2611_v1 }
 0x245   :  { %v494_v7 = vpop.f32.mrb[0].mxu1 }
 0x246   :  { %v498_v8 = vmul.f32 0.001953125, %v494_v7  ;;  %v1968_v9 = vpop.f32.mrb[1].mxu1  ;;  %v842_v7 = vld [vmem:[#allocation7] sm:$0xff] }
 0x248   :  { %1972 = vmatmul.mubr.msk.f32.vlgmr.msra.gmra.mrb[2].mxu1 %vm499_vm1, %v498_v8  ;;  %v843_v8 = vld [vmem:[#allocation7 + $0x8] sm:$0xff] }
 0x249   :  { %2340 = vmatpush3.bf16.msra.mxu1 %v2747_v30  ;;  %2006 = vmatprep.mubr.msk.f32.mxu1 %vm2612_vm0, %v2610_v0  ;;  %v573_v30 = vlaneseq  ;;  %v2394_v9 = vpack.c.bf16 %v843_v8, %v842_v7  ;;  %v1060_v7 = vld [vmem:[#allocation7 + $0x130] sm:$0xff]  ;;  %v1061_v8 = vld [vmem:[#allocation7 + $0x138] sm:$0xff] }
 0x24a   :  { %2341 = vmatprep.subr.bf16.mxu1 %v2611_v1 }
 0x24d   :  { %2343 = vmatpush3.bf16.msra.mxu1 %v2753_v34  ;;  %v574_v34 = vshrl.u32 %v573_v30, 7  ;;  %v1165_v30 = vld [vmem:[%s2999_s9] sm:$0xff] }
 0x24e   :  { %2344 = vmatprep.subr.bf16.mxu1 %v2611_v1 }
 0x251   :  { %2346 = vmatpush3.bf16.msra.mxu1 %v2763_v40  ;;  %v2834_v40 = vsub.s32 0, %v574_v34  ;;  %v1166_v34 = vld [vmem:[%s2999_s9 + $0x8] sm:$0xff] }
 0x252   :  { %2347 = vmatprep.subr.bf16.mxu1 %v2611_v1 }
 0x255   :  { %2349 = vmatpush3.bf16.msra.mxu1 %v2324_v42  ;;  %v863_v42 = vld [vmem:[#allocation7 + $0x80] sm:$0xff] }
 0x256   :  { %2350 = vmatprep.subr.bf16.mxu1 %v2611_v1  ;;  %v2362_v46 = vpack.c.bf16 %v864_v43, %v863_v42  ;;  %v849_v42 = vld [vmem:[#allocation7 + $0x38] sm:$0xff] }
 0x259   :  { %2352 = vmatpush3.bf16.msra.mxu1 %v2327_v45 }
 0x25a   :  { %2353 = vmatprep.subr.bf16.mxu1 %v2611_v1 }
 0x25d   :  { %2355 = vmatpush3.bf16.msra.mxu1 %v2330_v48  ;;  %v866_v48 = vld [vmem:[#allocation7 + $0x98] sm:$0xff] }
 0x25e   :  { %2356 = vmatprep.subr.bf16.mxu1 %v2611_v1  ;;  %v2366_v50 = vpack.c.bf16 %v866_v48, %v865_v47  ;;  %v852_v48 = vld [vmem:[#allocation7 + $0x50] sm:$0xff] }
 0x261   :  { %2358 = vmatpush3.bf16.msra.mxu1 %v2333_v51  ;;  %v867_v51 = vld [vmem:[#allocation7 + $0xa0] sm:$0xff] }
 0x262   :  { %2359 = vmatprep.subr.bf16.mxu1 %v2611_v1  ;;  %v2370_v53 = vpack.c.bf16 %v868_v52, %v867_v51  ;;  %v854_v51 = vld [vmem:[#allocation7 + $0x60] sm:$0xff]  ;;  %v855_v52 = vld [vmem:[#allocation7 + $0x68] sm:$0xff] }
 0x265   :  { %2361 = vmatpush3.bf16.msra.mxu1 %v2336_v54  ;;  %v869_v54 = vld [vmem:[#allocation7 + $0xb0] sm:$0xff] }
 0x266   :  { %2009 = vmatprep.subr.mxu1 %v2610_v0 }
 0x31b   :  { %v569_v10 = vpop.f32.mrb[2].mxu1 }
 0x31c   :  { %v576_v12 = vrot.slane %v569_v10, %v2834_v40  ;;  %v1973_v13 = vpop.f32.mrb[3].mxu1  ;;  %v1167_v10 = vld [vmem:[%s2999_s9 + $0x10] sm:$0xff] }
 0x31d   :  { %v1168_v13 = vld [vmem:[%s2999_s9 + $0x18] sm:$0xff] }
 0x31e   :  { %v2837_v15 = vsub.f32 %v377_v56, %v576_v12  ;;  %v2839_v16 = vsub.f32 %v1930_v55, %v576_v12  ;;  %v2841_v17 = vsub.f32 %v387_v59, %v576_v12  ;;  %v2843_v20 = vsub.f32 %v1933_v58, %v576_v12  ;;  %v870_v55 = vld [vmem:[#allocation7 + $0xb8] sm:$0xff]  ;;  %v872_v58 = vld [vmem:[#allocation7 + $0xc8] sm:$0xff] }
 0x31f   :  { %v2374_v56 = vpack.c.bf16 %v870_v55, %v869_v54  ;;  %v2378_v59 = vpack.c.bf16 %v872_v58, %v871_v57  ;;  %v2877_v12 = vpack.c.bf16 %v1166_v34, %v1165_v30  ;;  %v856_v54 = vld [vmem:[#allocation7 + $0x70] sm:$0xff]  ;;  %v857_v55 = vld [vmem:[#allocation7 + $0x78] sm:$0xff]  ;;  %v1054_v57 = vld [vmem:[#allocation7 + $0x100] sm:$0xff]  ;;  %v2438_v30 = vpack.c.bf16 %v1061_v8, %v1060_v7 }
 0x320   :  { %v581_v21 = vmul.f32 %v2837_v15, %v2837_v15  ;;  %v582_v22 = vmul.f32 %v2839_v16, %v2839_v16  ;;  %v583_v23 = vmul.f32 %v2841_v17, %v2841_v17  ;;  %v584_v25 = vmul.f32 %v2843_v20, %v2843_v20  ;;  %v1055_v58 = vld [vmem:[#allocation7 + $0x108] sm:$0xff]  ;;  %v1062_v34 = vld [vmem:[#allocation7 + $0x140] sm:$0xff] }
 0x321   :  { %2460 = vmatpush3.bf16.msra.mxu0 %v2877_v12 }
 0x322   :  { %v585_v24 = vadd.f32 %v582_v22, %v581_v21  ;;  %v2883_v21 = vpack.c.bf16 %v1168_v13, %v1167_v10  ;;  %2461 = vmatprep.subr.bf16.mxu0 %v2611_v1  ;;  %v1063_v10 = vld [vmem:[#allocation7 + $0x148] sm:$0xff] }
 0x323   :  { %v2442_v13 = vpack.c.bf16 %v1063_v10, %v1062_v34 }
 0x324   :  { %v586_v26 = vadd.f32 %v585_v24, %v583_v23 }
 0x325   :  { %2463 = vmatpush3.bf16.msra.mxu0 %v2883_v21 }
 0x326   :  { %v587_v27 = vadd.f32 %v586_v26, %v584_v25  ;;  %2464 = vmatprep.subr.bf16.mxu0 %v2611_v1 }
 0x328   :  { %v588_v28 = vrot.slane %v587_v27, 4 }
 0x32a   :  { %v589_v29 = vadd.f32 %v588_v28, %v587_v27 }
 0x32c   :  { %v590_v31 = vrot.slane %v589_v29, 2 }
 0x32e   :  { %v591_v32 = vadd.f32 %v590_v31, %v589_v29 }
 0x330   :  { %v592_v33 = vrot.slane %v591_v32, 1 }
 0x332   :  { %v593_v35 = vadd.f32 %v592_v33, %v591_v32  ;;  %v844_v33 = vld [vmem:[#allocation7 + $0x10] sm:$0xff] }
 0x334   :  { %2007 = vmatmul.mubr.f32.vlgmr.msra.gmra.mrb[4].mxu1 %v593_v35  ;;  %v845_v35 = vld [vmem:[#allocation7 + $0x18] sm:$0xff] }
 0x335   :  { %2010 = vmatpush3.msra.mxu1 %v2814_v6  ;;  %2011 = vmatprep.mubr.msk.f32.mxu1 %vm2612_vm0, %v2610_v0 }
 0x336   :  { %2014 = vmatprep.subr.mxu1 %v2610_v0 }
 0x407   :  { %v660_v36 = vpop.f32.mrb[4].mxu1 }
 0x408   :  { %v664_v37 = vmul.f32 0.001953125, %v660_v36  ;;  %v2008_v38 = vpop.f32.mrb[5].mxu1 }
 0x40a   :  { %v665_v39 = vadd.f32 1e-05, %v664_v37 }
 0x40c   :  { %2530 = vrsqrt.f32 %v665_v39 }
 0x416   :  { %v2531_v44 = vpop.eup %2530 }
 0x417   :  { %v667_v45 = vmul.f32 %v2531_v44, %v400_v41  ;;  %v2398_v41 = vpack.c.bf16 %v845_v35, %v844_v33 }
 0x419   :  { %2012 = vmatmul.mubr.msk.f32.vlgmr.msra.gmra.mrb[6].mxu1 %vm499_vm1, %v667_v45  ;;  %v850_v45 = vld [vmem:[#allocation7 + $0x40] sm:$0xff] }
 0x41a   :  { %2015 = vmatpush3.msra.mxu1 %v2814_v6  ;;  %2016 = vmatprep.mubr.msk.f32.mxu1 %vm2612_vm0, %v2610_v0  ;;  %v2390_v6 = vpack.c.bf16 %v878_v5, %v877_v4 }
 0x41b   :  { %2363 = vmatprep.subr.bf16.mxu1 %v2362_v46 }
 0x41d   :  { %2017 = vmatmul.mubr.msk.f32.vlgmr.msra.gmra.mrb[8].mxu1 %vm499_vm1, %v401_v49  ;;  %v853_v49 = vld [vmem:[#allocation7 + $0x58] sm:$0xff] }
 0x41e   :  { %2365 = vmatpush3.bf16.msra.mxu1 %v2362_v46  ;;  %v851_v46 = vld [vmem:[#allocation7 + $0x48] sm:$0xff] }
 0x41f   :  { %2367 = vmatprep.subr.bf16.mxu1 %v2366_v50  ;;  %v2410_v47 = vpack.c.bf16 %v851_v46, %v850_v45  ;;  %v1177_v45 = vld [vmem:[%s2999_s9 + $0x60] sm:$0xff]  ;;  %v1178_v46 = vld [vmem:[%s2999_s9 + $0x68] sm:$0xff] }
 0x422   :  { %2369 = vmatpush3.bf16.msra.mxu1 %v2366_v50  ;;  %v2414_v50 = vpack.c.bf16 %v853_v49, %v852_v48  ;;  %v1179_v48 = vld [vmem:[%s2999_s9 + $0x70] sm:$0xff]  ;;  %v1180_v49 = vld [vmem:[%s2999_s9 + $0x78] sm:$0xff] }
 0x423   :  { %2371 = vmatprep.subr.bf16.mxu1 %v2370_v53 }
 0x426   :  { %2373 = vmatpush3.bf16.msra.mxu1 %v2370_v53  ;;  %v2418_v53 = vpack.c.bf16 %v855_v52, %v854_v51 }
 0x427   :  { %2375 = vmatprep.subr.bf16.mxu1 %v2374_v56 }
 0x42a   :  { %2377 = vmatpush3.bf16.msra.mxu1 %v2374_v56  ;;  %v2422_v56 = vpack.c.bf16 %v857_v55, %v856_v54 }
 0x42b   :  { %2379 = vmatprep.subr.bf16.mxu1 %v2378_v59 }
 0x42e   :  { %2381 = vmatpush3.bf16.msra.mxu1 %v2378_v59  ;;  %v2426_v59 = vpack.c.bf16 %v1055_v58, %v1054_v57 }
 0x42f   :  { %2383 = vmatprep.subr.bf16.mxu1 %v2382_v62 }
 0x432   :  { %2385 = vmatpush3.bf16.msra.mxu1 %v2382_v62  ;;  %v2430_v62 = vpack.c.bf16 %v1057_v61, %v1056_v60 }
 0x433   :  { %2387 = vmatprep.subr.bf16.mxu1 %v2386_v3 }
 0x436   :  { %2389 = vmatpush3.bf16.msra.mxu1 %v2386_v3  ;;  %v1059_v3 = vld [vmem:[#allocation7 + $0x128] sm:$0xff] }
 0x437   :  { %2391 = vmatprep.subr.bf16.mxu1 %v2390_v6  ;;  %v2434_v5 = vpack.c.bf16 %v1059_v3, %v1058_v2 }
 0x43a   :  { %2393 = vmatpush3.bf16.msra.mxu1 %v2390_v6 }
 0x43b   :  { %2395 = vmatprep.subr.bf16.mxu1 %v2394_v9 }
 0x4ec   :  { %v737_v22 = vpop.f32.mrb[6].mxu1 }
 0x4ed   :  { %v817_v23 = vrot.slane %v737_v22, %v2834_v40  ;;  %v2013_v24 = vpop.f32.mrb[7].mxu1  ;;  %v1064_v22 = vld [vmem:[#allocation7 + $0x150] sm:$0xff] }
 0x4ef   :  { %v818_v25 = vmul.f32 %v817_v23, %v2837_v15  ;;  %v819_v27 = vmul.f32 %v817_v23, %v2839_v16  ;;  %v820_v28 = vmul.f32 %v817_v23, %v2841_v17  ;;  %v821_v29 = vmul.f32 %v817_v23, %v2843_v20  ;;  %v846_v15 = vld [vmem:[#allocation7 + $0x20] sm:$0xff]  ;;  %v847_v16 = vld [vmem:[#allocation7 + $0x28] sm:$0xff]  ;;  %v848_v20 = vld [vmem:[#allocation7 + $0x30] sm:$0xff] }
 0x4f0   :  { %v810_v26 = vpop.f32.mrb[8].mxu1  ;;  %v2402_v17 = vpack.c.bf16 %v847_v16, %v846_v15  ;;  %v2406_v44 = vpack.c.bf16 %v849_v42, %v848_v20  ;;  %v1065_v23 = vld [vmem:[#allocation7 + $0x158] sm:$0xff]  ;;  %v1173_v16 = vld [vmem:[%s2999_s9 + $0x40] sm:$0xff]  ;;  %v1175_v42 = vld [vmem:[%s2999_s9 + $0x50] sm:$0xff] }
 0x4f1   :  { %v825_v31 = vrot.slane %v810_v26, %v2834_v40  ;;  %v2018_v32 = vpop.f32.mrb[9].mxu1  ;;  %v2446_v24 = vpack.c.bf16 %v1065_v23, %v1064_v22  ;;  %v1067_v26 = vld [vmem:[#allocation7 + $0x168] sm:$0xff] }
 0x4f3   :  { %v826_v36 = vadd.f32 %v825_v31, %v818_v25  ;;  %v827_v37 = vadd.f32 %v825_v31, %v819_v27  ;;  %v828_v38 = vadd.f32 %v825_v31, %v820_v28  ;;  %v829_v39 = vadd.f32 %v825_v31, %v821_v29  ;;  %v1066_v25 = vld [vmem:[#allocation7 + $0x160] sm:$0xff]  ;;  %v1068_v28 = vld [vmem:[#allocation7 + $0x170] sm:$0xff]  ;;  %v1069_v29 = vld [vmem:[#allocation7 + $0x178] sm:$0xff] }
 0x4f4   :  { %v2450_v27 = vpack.c.bf16 %v1067_v26, %v1066_v25  ;;  %v2454_v31 = vpack.c.bf16 %v1069_v29, %v1068_v28 }
 0x4f5   :  { %834 = vst [vmem:[#allocation3 + $0x1] sm:$0xff] %v826_v36  ;;  %835 = vst [vmem:[#allocation3 + $0x9] sm:$0xff] %v827_v37  ;;  %2051 = vmatprep.mubr.f32.mxu1 %v826_v36  ;;  %v1169_v36 = vld [vmem:[%s2999_s9 + $0x20] sm:$0xff] }
 0x4f6   :  { %836 = vst [vmem:[#allocation3 + $0x19] sm:$0xff] %v828_v38  ;;  %837 = vst [vmem:[#allocation3 + $0x21] sm:$0xff] %v829_v39  ;;  %2052 = vmatmul.mubr.f32.vlgmr.msra.gmra.mrb[10].mxu1 %v827_v37  ;;  %v1170_v37 = vld [vmem:[%s2999_s9 + $0x28] sm:$0xff] }
 0x4f7   :  { %2397 = vmatpush3.bf16.msra.mxu1 %v2394_v9  ;;  %2054 = vmatprep.mubr.f32.mxu1 %v828_v38  ;;  %v2465_v38 = vpack.c.bf16 %v1170_v37, %v1169_v36  ;;  %v1163_v37 = vld [vmem:[%s2997_s7] sm:$0x1]  ;;  %s2613_s7 = smov [#allocation9]  }
 0x4f8   :  { %2399 = vmatprep.subr.bf16.mxu1 %v2398_v41  ;;  %s1601_s19 = sshll.u32 %s2613_s7, 4  ;;  %s1602_s19 = int_to_ptr.vmem [resolvable:$true] %s1601_s19 }
 0x4f9   :  { %2466 = vmatpush3.bf16.msra.mxu0 %v2465_v38  ;;  %p2583_p3 = scmp.lt.s32.totalorder %s1602_s19, %s1602_s19 }
 0x4fa   :  { %2055 = vmatmul.mubr.f32.gmra.mrb[12].mxu1 %v829_v39  ;;  %2467 = vmatprep.subr.bf16.mxu0 %v2611_v1  ;;  %v1171_v39 = vld [vmem:[%s2999_s9 + $0x30] sm:$0xff] }
 0x4fb   :  { %2401 = vmatpush3.bf16.msra.mxu1 %v2398_v41  ;;  %v1172_v41 = vld [vmem:[%s2999_s9 + $0x38] sm:$0xff] }
 0x4fc   :  { %v838_v43 = vld [vmem:[#allocation3] sm:$0xff]  ;;  %2403 = vmatprep.subr.bf16.mxu1 %v2402_v17  ;;  %v839_v63 = vld [vmem:[#allocation3 + $0x8] sm:$0xff]  ;;  %v2468_v15 = vpack.c.bf16 %v1172_v41, %v1171_v39  ;;  %v1164_v41 = vld [vmem:[%s2998_s8] sm:$0x1]  ;;  %s2578_s8 = scalar_lea.vmem %s1602_s19, 512 }
 0x4fd   :  { %2089 = vmatprep.mubr.f32.mxu1 %v838_v43  ;;  %v840_v4 = vld [vmem:[#allocation3 + $0x18] sm:$0xff]  ;;  %v841_v6 = vld [vmem:[#allocation3 + $0x20] sm:$0xff]  ;;  %v1050_v32 = vld [vmem:[#allocation3 + $0xa] sm:$0xff]  ;;  %p2579_p2 = scmp.ne.s32.totalorder %s1602_s19, %s2578_s8  ;;  %p2584_p4 = scmp.lt.s32.totalorder %s2578_s8, %s2578_s8 }
 0x4fe   :  { %v1049_v9 = vld [vmem:[#allocation3 + $0x2] sm:$0xff]  ;;  %v1051_v33 = vld [vmem:[#allocation3 + $0x1a] sm:$0xff]  ;;  %2469 = vmatpush3.bf16.msra.mxu0 %v2468_v15 }
 0x4ff   :  { %2405 = vmatpush3.bf16.msra.mxu1 %v2402_v17  ;;  %v1052_v35 = vld [vmem:[#allocation3 + $0x22] sm:$0xff]  ;;  %2470 = vmatprep.subr.bf16.mxu0 %v2611_v1  ;;  %v1174_v17 = vld [vmem:[%s2999_s9 + $0x48] sm:$0xff]  ;;  %p2585_p5 = por %p2584_p4, %p2583_p3 }
 0x500   :  { %2407 = vmatprep.subr.bf16.mxu1 %v2406_v44  ;;  %v2471_v20 = vpack.c.bf16 %v1174_v17, %v1173_v16  ;;  %v1176_v43 = vld [vmem:[%s2999_s9 + $0x58] sm:$0xff] }
 0x501   :  { %p2586_p6 = pnand %p2585_p5, %p2579_p2 }
 0x502   :  { %2472 = vmatpush3.bf16.msra.mxu0 %v2471_v20 }
 0x503   :  { %2409 = vmatpush3.bf16.msra.mxu1 %v2406_v44  ;;  %2473 = vmatprep.subr.bf16.mxu0 %v2611_v1  ;;  %v2474_v44 = vpack.c.bf16 %v1176_v43, %v1175_v42 }
 0x504   :  { %2411 = vmatprep.subr.bf16.mxu1 %v2410_v47 }
 0x506   :  { %2475 = vmatpush3.bf16.msra.mxu0 %v2474_v44 }
 0x507   :  { %2413 = vmatpush3.bf16.msra.mxu1 %v2410_v47  ;;  %2476 = vmatprep.subr.bf16.mxu0 %v2611_v1  ;;  %v2477_v47 = vpack.c.bf16 %v1178_v46, %v1177_v45 }
 0x508   :  { %2415 = vmatprep.subr.bf16.mxu1 %v2414_v50 }
 0x50a   :  { %2478 = vmatpush3.bf16.msra.mxu0 %v2477_v47 }
 0x50b   :  { %2417 = vmatpush3.bf16.msra.mxu1 %v2414_v50  ;;  %2479 = vmatprep.subr.bf16.mxu0 %v2611_v1  ;;  %v2480_v50 = vpack.c.bf16 %v1180_v49, %v1179_v48 }
 0x50c   :  { %2419 = vmatprep.subr.bf16.mxu1 %v2418_v53 }
 0x50e   :  { %2481 = vmatpush3.bf16.msra.mxu0 %v2480_v50 }
 0x50f   :  { %2421 = vmatpush3.bf16.msra.mxu1 %v2418_v53  ;;  %2168 = vmatprep.subr.mxu0 %v2610_v0 }
 0x510   :  { %2423 = vmatprep.subr.bf16.mxu1 %v2422_v56 }
 0x513   :  { %2425 = vmatpush3.bf16.msra.mxu1 %v2422_v56 }
 0x514   :  { %2427 = vmatprep.subr.bf16.mxu1 %v2426_v59 }
 0x516   :  { %2090 = vmatmul.mubr.f32.vlgmr.msra.gmra.mrb[10].mxu1 %v839_v63 }
 0x517   :  { %2092 = vmatprep.mubr.f32.mxu1 %v840_v4  ;;  %2429 = vmatpush3.bf16.msra.mxu1 %v2426_v59 }
 0x518   :  { %2431 = vmatprep.subr.bf16.mxu1 %v2430_v62 }
 0x51a   :  { %2093 = vmatmul.mubr.f32.gmra.mrb[12].mxu1 %v841_v6 }
 0x51b   :  { %2433 = vmatpush3.bf16.msra.mxu1 %v2430_v62  ;;  %2127 = vmatprep.mubr.f32.mxu1 %v1049_v9 }
 0x51c   :  { %2435 = vmatprep.subr.bf16.mxu1 %v2434_v5 }
 0x51f   :  { %2437 = vmatpush3.bf16.msra.mxu1 %v2434_v5 }
 0x520   :  { %2439 = vmatprep.subr.bf16.mxu1 %v2438_v30 }
 0x523   :  { %2441 = vmatpush3.bf16.msra.mxu1 %v2438_v30 }
 0x524   :  { %2443 = vmatprep.subr.bf16.mxu1 %v2442_v13 }
 0x527   :  { %2445 = vmatpush3.bf16.msra.mxu1 %v2442_v13 }
 0x528   :  { %2447 = vmatprep.subr.bf16.mxu1 %v2446_v24 }
 0x52b   :  { %2449 = vmatpush3.bf16.msra.mxu1 %v2446_v24 }
 0x52c   :  { %2451 = vmatprep.subr.bf16.mxu1 %v2450_v27 }
 0x52f   :  { %2453 = vmatpush3.bf16.msra.mxu1 %v2450_v27 }
 0x530   :  { %2455 = vmatprep.subr.bf16.mxu1 %v2454_v31 }
 0x533   :  { %2457 = vmatpush3.bf16.msra.mxu1 %v2454_v31 }
 0x536   :  { %2128 = vmatmul.mubr.f32.vlgmr.msra.gmra.mrb[10].mxu1 %v1050_v32 }
 0x537   :  { %2130 = vmatprep.mubr.f32.mxu1 %v1051_v33 }
 0x53a   :  { %2131 = vmatmul.mubr.f32.gmra.mrb[12].mxu1 %v1052_v35 }
 0x609   :  { %v2129_v51 = vpop.f32.mrb[10].mxu1 }
 0x60a   :  { %v1136_v52 = vpop.f32.mrb[11].mxu1  ;;  %v1160_v53 = vadd.f32 %v2129_v51, %v2723_v14  ;;  %v1181_v14 = vld [vmem:[%s3000_s10] sm:$0xff] }
 0x60b   :  { %v1159_v54 = vadd.f32 %v1136_v52, %v2716_v11 }
 0x60d   :  { %v2132_v55 = vpop.f32.mrb[12].mxu1  ;;  %v1182_v57 = vadd.f32 %v1160_v53, %v1159_v54 }
 0x60e   :  { %v1146_v56 = vpop.f32.mrb[13].mxu1  ;;  %v1162_v59 = vadd.f32 %v2132_v55, %v2735_v19 }
 0x60f   :  { %v1161_v58 = vadd.f32 %v1146_v56, %v2729_v18 }
 0x611   :  { %v1183_v60 = vadd.f32 %v1182_v57, %v1161_v58 }
 0x613   :  { %v1184_v61 = vadd.f32 %v1183_v60, %v1162_v59 }
 0x615   :  { %v1185_v62 = vrot.slane %v1184_v61, 4 }
 0x617   :  { %v1186_v63 = vadd.f32 %v1185_v62, %v1184_v61 }
 0x619   :  { %v1187_v2 = vrot.slane %v1186_v63, 2 }
 0x61b   :  { %v1188_v3 = vadd.f32 %v1187_v2, %v1186_v63 }
 0x61d   :  { %v1189_v4 = vrot.slane %v1188_v3, 1 }
 0x61f   :  { %v1190_v5 = vadd.f32 %v1189_v4, %v1188_v3 }
 0x621   :  { %2166 = vmatmul.mubr.f32.vlgmr.msra.gmra.mrb[4].mxu0 %v1190_v5 }
 0x622   :  { %2169 = vmatpush3.msra.mxu0 %v1181_v14  ;;  %2170 = vmatprep.mubr.msk.f32.mxu0 %vm2612_vm0, %v2610_v0 }
 0x623   :  { %2482 = vmatprep.subr.bf16.mxu0 %v2611_v1 }
 0x6f4   :  { %v1257_v11 = vpop.f32.mrb[4].mxu0 }
 0x6f5   :  { %v1261_v18 = vmul.f32 0.001953125, %v1257_v11  ;;  %v2167_v19 = vpop.f32.mrb[5].mxu0 }
 0x6f7   :  { %2171 = vmatmul.mubr.msk.f32.vlgmr.msra.gmra.mrb[6].mxu0 %vm499_vm1, %v1261_v18 }
 0x6f8   :  { %2484 = vmatpush3.bf16.msra.mxu0 %v2877_v12  ;;  %2205 = vmatprep.mubr.msk.f32.mxu0 %vm2612_vm0, %v2610_v0 }
 0x6f9   :  { %2485 = vmatprep.subr.bf16.mxu0 %v2611_v1 }
 0x6fc   :  { %2487 = vmatpush3.bf16.msra.mxu0 %v2883_v21 }
 0x6fd   :  { %2488 = vmatprep.subr.bf16.mxu0 %v2611_v1 }
 0x700   :  { %2490 = vmatpush3.bf16.msra.mxu0 %v2465_v38 }
 0x701   :  { %2491 = vmatprep.subr.bf16.mxu0 %v2611_v1 }
 0x704   :  { %2493 = vmatpush3.bf16.msra.mxu0 %v2468_v15 }
 0x705   :  { %2494 = vmatprep.subr.bf16.mxu0 %v2611_v1 }
 0x708   :  { %2496 = vmatpush3.bf16.msra.mxu0 %v2471_v20 }
 0x709   :  { %2497 = vmatprep.subr.bf16.mxu0 %v2611_v1 }
 0x70c   :  { %2499 = vmatpush3.bf16.msra.mxu0 %v2474_v44 }
 0x70d   :  { %2500 = vmatprep.subr.bf16.mxu0 %v2611_v1 }
 0x710   :  { %2502 = vmatpush3.bf16.msra.mxu0 %v2477_v47 }
 0x711   :  { %2503 = vmatprep.subr.bf16.mxu0 %v2611_v1 }
 0x714   :  { %2505 = vmatpush3.bf16.msra.mxu0 %v2480_v50 }
 0x715   :  { %2208 = vmatprep.subr.mxu0 %v2610_v0 }
 0x7ca   :  { %v1331_v12 = vpop.f32.mrb[6].mxu0 }
 0x7cb   :  { %v1338_v21 = vrot.slane %v1331_v12, %v2834_v40  ;;  %v2172_v6 = vpop.f32.mrb[7].mxu0 }
 0x7cd   :  { %v1339_v7 = vsub.f32 %v1159_v54, %v1338_v21  ;;  %v1340_v8 = vsub.f32 %v1160_v53, %v1338_v21  ;;  %v1341_v9 = vsub.f32 %v1161_v58, %v1338_v21  ;;  %v1342_v30 = vsub.f32 %v1162_v59, %v1338_v21 }
 0x7cf   :  { %v1343_v34 = vmul.f32 %v1339_v7, %v1339_v7  ;;  %v1344_v10 = vmul.f32 %v1340_v8, %v1340_v8  ;;  %v1345_v13 = vmul.f32 %v1341_v9, %v1341_v9  ;;  %v1346_v23 = vmul.f32 %v1342_v30, %v1342_v30 }
 0x7d1   :  { %v1347_v22 = vadd.f32 %v1344_v10, %v1343_v34 }
 0x7d3   :  { %v1348_v24 = vadd.f32 %v1347_v22, %v1345_v13 }
 0x7d5   :  { %v1349_v25 = vadd.f32 %v1348_v24, %v1346_v23 }
 0x7d7   :  { %v1350_v26 = vrot.slane %v1349_v25, 4 }
 0x7d9   :  { %v1351_v1 = vadd.f32 %v1350_v26, %v1349_v25 }
 0x7db   :  { %v1352_v27 = vrot.slane %v1351_v1, 2 }
 0x7dd   :  { %v1353_v28 = vadd.f32 %v1352_v27, %v1351_v1 }
 0x7df   :  { %v1354_v29 = vrot.slane %v1353_v28, 1 }
 0x7e1   :  { %v1355_v31 = vadd.f32 %v1354_v29, %v1353_v28 }
 0x7e3   :  { %2206 = vmatmul.mubr.f32.vlgmr.msra.gmra.mrb[8].mxu0 %v1355_v31 }
 0x7e4   :  { %2209 = vmatpush3.msra.mxu0 %v1181_v14  ;;  %2210 = vmatprep.mubr.msk.f32.mxu0 %vm2612_vm0, %v2610_v0 }
 0x7e5   :  { %2213 = vmatprep.subr.mxu0 %v2610_v0 }
 0x8b6   :  { %v1422_v32 = vpop.f32.mrb[8].mxu0 }
 0x8b7   :  { %v1426_v33 = vmul.f32 0.001953125, %v1422_v32  ;;  %v2207_v35 = vpop.f32.mrb[9].mxu0 }
 0x8b9   :  { %v1427_v36 = vadd.f32 1e-05, %v1426_v33 }
 0x8bb   :  { %2532 = vrsqrt.f32 %v1427_v36 }
 0x8c5   :  { %v2533_v38 = vpop.eup %2532 }
 0x8c6   :  { %v1429_v39 = vmul.f32 %v2533_v38, %v1163_v37 }
 0x8c8   :  { %2211 = vmatmul.mubr.msk.f32.vlgmr.msra.gmra.mrb[10].mxu0 %vm499_vm1, %v1429_v39 }
 0x8c9   :  { %2214 = vmatpush3.msra.mxu0 %v1181_v14  ;;  %2215 = vmatprep.mubr.msk.f32.mxu0 %vm2612_vm0, %v2610_v0 }
 0x8cc   :  { %2216 = vmatmul.mubr.msk.f32.vlgmr.msra.gmra.mrb[12].mxu0 %vm499_vm1, %v1164_v41 }
 0x99b   :  { %v1499_v15 = vpop.f32.mrb[10].mxu0 }
 0x99c   :  { %v1579_v16 = vrot.slane %v1499_v15, %v2834_v40  ;;  %v2212_v17 = vpop.f32.mrb[11].mxu0 }
 0x99e   :  { %v1580_v20 = vmul.f32 %v1579_v16, %v1339_v7  ;;  %v1581_v43 = vmul.f32 %v1579_v16, %v1340_v8  ;;  %v1582_v44 = vmul.f32 %v1579_v16, %v1341_v9  ;;  %v1583_v45 = vmul.f32 %v1579_v16, %v1342_v30 }
 0x99f   :  { %v1572_v42 = vpop.f32.mrb[12].mxu0 }
 0x9a0   :  { %v1587_v46 = vrot.slane %v1572_v42, %v2834_v40  ;;  %v2217_v0 = vpop.f32.mrb[13].mxu0 }
 0x9a2   :  { %v1588_v47 = vadd.f32 %v1587_v46, %v1580_v20  ;;  %v1589_v48 = vadd.f32 %v1587_v46, %v1581_v43  ;;  %v1590_v49 = vadd.f32 %v1587_v46, %v1582_v44  ;;  %v1591_v50 = vadd.f32 %v1587_v46, %v1583_v45 }
 0x9a4   :  { %1592 = vst [vmem:[#allocation9] sm:$0xff] %v1588_v47  ;;  %1593 = vst [vmem:[#allocation9 + $0x8] sm:$0xff] %v1589_v48 }
 0x9a5   :  { %1594 = vst [vmem:[#allocation9 + $0x10] sm:$0xff] %v1590_v49  ;;  %1595 = vst [vmem:[#allocation9 + $0x18] sm:$0xff] %v1591_v50 }
 0x9a6   :  { %2589 = shalt.err (!%p2586_p6)
}
 0x9a7   :  { %s2590_s22 = scalar_lea.hbm %s3001_s11, 512 }
 0x9a8   :  { %p2591_p7 = scmp.ne.s32.totalorder %s3001_s11, %s2590_s22  ;;  %p2594_p8 = scmp.lt.u32.totalorder %s2590_s22, %s3001_s11 }
 0x9aa   :  { %p2596_p9 = pnand %p2594_p8, %p2591_p7 }
 0x9ac   :  { %2599 = shalt.err (!%p2596_p9)
}
 0x9ad   :  { %1607 = dma.vmem_to_hbm [thread:$0]  %s1602_s19, 512, %s3001_s11, [#allocation6], %s2607_s27, %s2607_s27, %s2608_s28  }
 0x9ae   :  { %2604 = dma.done.wait [#allocation6], 512  }
 0x9af   :  { %2605 = vsyncadd [#allocation6], 4294966784 }
 0x9b0   :  { %1611 = vsyncpa [#allocation5], 1 }
 0x9b1   :  { %1612 = vsyncpa [#allocation8], 1 }
 0x9b2   :  { %1613 = vsyncpa [#allocation6], 1 }

</bundles_post_ra>
